<compile_context>
chip_gen: v6e
topology: v6e:2x2x1
jax: 0.10.0
libtpu: 0.0.40
codegen_flags: <defaults>
</compile_context>

<pallas_src>
import functools

import jax
import jax.numpy as jnp
from jax.experimental import pallas as pl
from jax.experimental.pallas import tpu as pltpu


# Model config (matches rlpyt AtariLstmModel defaults for channels/kernels/strides).
CHANNELS = (16, 32)
KERNELS = (8, 4)
STRIDES = (4, 2)
PADDINGS = (0, 1)
HEAD_W = 128          # lane-dense pi||v output slab width


# -----------------------------------------------------------------------------
# Kernel A: conv1 = (OC,K)@(K, N*OH*OW) matmul, then *1/255 + bias + ReLU
# -----------------------------------------------------------------------------
def _conv1_kernel(p_ref, w_ref, b_ref, o_ref):
    # p_ref: (K, M) bf16 holding raw 0..255 pixel values (exact in bf16).
    # Scale applied to the f32 accumulator (linear in x), not the patch matrix.
    y = jnp.dot(w_ref[...], p_ref[...], preferred_element_type=jnp.float32)  # (OC, M)
    y = y * (1.0 / 255.0) + b_ref[...]                                       # b: (OC, 1)
    o_ref[...] = jnp.maximum(y, 0.0).astype(o_ref.dtype)


def conv1_pallas(patches_km, w1, b1):
    K, M = patches_km.shape
    OC = w1.shape[0]
    vmem = pl.BlockSpec(memory_space=pltpu.MemorySpace.VMEM)
    return pl.pallas_call(
        _conv1_kernel,
        out_shape=jax.ShapeDtypeStruct((OC, M), jnp.bfloat16),
        in_specs=[vmem, vmem, vmem],
        out_specs=vmem,
    )(patches_km, w1, b1)


# -----------------------------------------------------------------------------
# Kernel B: conv2 matmul + fc + full LSTM time loop + batched fused pi/v head
# -----------------------------------------------------------------------------
def _fused_kernel(p2_ref, w2_ref, b2_ref, wf_ref, bfc_ref,
                  wih_fc_ref, wih_ex_ref, whh_ref, bl_ref,
                  extra_ref, h0_ref, c0_ref, wh_ref, bh_ref,
                  head_ref, hn_ref, cn_ref,
                  h_all_ref, *, T, B, H, A):
    f32 = jnp.float32
    bf16 = jnp.bfloat16

    # conv2 (patches provided by glue) + ReLU : (T*B, K2) @ (K2, OC2)
    c2 = jnp.dot(p2_ref[...], w2_ref[...], preferred_element_type=f32) + b2_ref[...]
    c2 = jnp.maximum(c2, 0.0)

    # fc + ReLU : (T*B, OC2) @ (OC2, fc)
    fc = jnp.dot(c2.astype(bf16), wf_ref[...], preferred_element_type=f32) + bfc_ref[...]
    fc = jnp.maximum(fc, 0.0)

    # Input->gate contributions for ALL timesteps at once (fc part + action/
    # reward part); the per-step loop only does the recurrent h @ W_hh matmul.
    gx = jnp.dot(fc.astype(bf16), wih_fc_ref[...], preferred_element_type=f32)
    gx = gx + jnp.dot(extra_ref[...], wih_ex_ref[...], preferred_element_type=f32)
    gx = gx + bl_ref[...]                                    # (T*B, 4H)

    h = h0_ref[...].astype(f32)
    c = c0_ref[...].astype(f32)

    # Static unroll over T (small); h/c stay in vregs, no grid-step overhead.
    for t in range(T):
        g = gx[t * B:(t + 1) * B, :] + jnp.dot(
            h.astype(bf16), whh_ref[...], preferred_element_type=f32)   # (B, 4H)
        # 4H == 128 == one lane width; static lane slices are cheap here.
        i_g = jax.nn.sigmoid(g[:, 0:H])
        f_g = jax.nn.sigmoid(g[:, H:2 * H])
        g_g = jnp.tanh(g[:, 2 * H:3 * H])
        o_g = jax.nn.sigmoid(g[:, 3 * H:4 * H])
        c = f_g * c + i_g * g_g
        h = o_g * jnp.tanh(c)
        # Stage this step's h; static offsets -> cheap partial store, hidden
        # under the (EUP-bound) recurrent loop.
        h_all_ref[pl.ds(t * B, B), :] = h

    # ONE batched head matmul + masked softmax for all T*B rows:
    # pi in lanes [0, A), raw value estimate in lane A, zeros elsewhere.
    hs = h_all_ref[...]                                       # (T*B, H)
    y = jnp.dot(hs.astype(bf16), wh_ref[...], preferred_element_type=f32) + bh_ref[...]
    col = jax.lax.broadcasted_iota(jnp.int32, (T * B, HEAD_W), 1)
    pi_mask = col < A
    ym = jnp.where(pi_mask, y, -jnp.inf)
    m = jnp.max(ym, axis=-1, keepdims=True)
    e = jnp.exp(ym - m)                                       # masked lanes -> 0
    s = jnp.sum(e, axis=-1, keepdims=True)
    pi = e * pl.reciprocal(s, approx=True)
    head_ref[...] = jnp.where(pi_mask, pi, y).astype(head_ref.dtype)   # (T*B, 128)

    # Final RNN state written exactly once.
    hn_ref[...] = h.astype(hn_ref.dtype)
    cn_ref[...] = c.astype(cn_ref.dtype)


def fused_pallas(p2, prep, extra, h0, c0, *, T, B, H, A):
    vmem = pl.BlockSpec(memory_space=pltpu.MemorySpace.VMEM)
    return pl.pallas_call(
        functools.partial(_fused_kernel, T=T, B=B, H=H, A=A),
        out_shape=(jax.ShapeDtypeStruct((T * B, HEAD_W), jnp.float32),
                   jax.ShapeDtypeStruct((B, H), jnp.float32),
                   jax.ShapeDtypeStruct((B, H), jnp.float32)),
        in_specs=[vmem] * 14,
        out_specs=(vmem, vmem, vmem),
        scratch_shapes=[pltpu.VMEM((T * B, H), jnp.float32)],
    )(p2, prep["w2"], prep["b2"], prep["fc_w"], prep["fc_b"],
      prep["wih_fc"], prep["wih_ex"], prep["whh"], prep["lstm_b"],
      extra, h0, c0, prep["w_heads"], prep["b_heads"])


# -----------------------------------------------------------------------------
# im2col glue (XLA).  Patch rows/cols ordered to match w.reshape(OC, C*KH*KW).
# -----------------------------------------------------------------------------
def _im2col_patches(x, KH, KW, stride, pad):
    N, C, Hh, W = x.shape
    if pad:
        x = jnp.pad(x, ((0, 0), (0, 0), (pad, pad), (pad, pad)))
    OH = (Hh + 2 * pad - KH) // stride + 1
    OW = (W + 2 * pad - KW) // stride + 1
    cols = []
    for kh in range(KH):
        for kw in range(KW):
            cols.append(x[:, :,
                          kh:kh + stride * OH:stride,
                          kw:kw + stride * OW:stride])       # (N, C, OH, OW)
    p = jnp.stack(cols, axis=-1)                             # (N, C, OH, OW, KH*KW)
    return p, OH, OW


def im2col_mk(x, KH, KW, stride, pad):
    """Rows = (n, oh, ow), cols = (c, kh, kw)."""
    p, OH, OW = _im2col_patches(x, KH, KW, stride, pad)
    N, C = x.shape[0], x.shape[1]
    return p.transpose(0, 2, 3, 1, 4).reshape(N * OH * OW, C * KH * KW), OH, OW


def im2col_km(x, KH, KW, stride, pad):
    """Rows = (c, kh, kw), cols = (n, oh, ow)  (transposed — puts M on lanes)."""
    p, OH, OW = _im2col_patches(x, KH, KW, stride, pad)
    N, C = x.shape[0], x.shape[1]
    return p.transpose(1, 4, 0, 2, 3).reshape(C * KH * KW, N * OH * OW), OH, OW


# -----------------------------------------------------------------------------
# Parameter construction / kernel-layout preparation
# -----------------------------------------------------------------------------
def make_params(key, in_ch, conv_channels, kernel_sizes, conv_out_size,
                fc_size, lstm_size, output_size):
    ks = jax.random.split(key, 12)

    def unif(k, shape, fan_in):
        bound = 1.0 / jnp.sqrt(jnp.float32(fan_in))
        return jax.random.uniform(k, shape, jnp.float32, -bound, bound)

    c1, c2 = conv_channels
    k1, k2 = kernel_sizes
    lstm_in = fc_size + output_size + 1
    return {
        "conv1_w": unif(ks[0], (c1, in_ch, k1, k1), in_ch * k1 * k1),
        "conv1_b": unif(ks[1], (c1,), in_ch * k1 * k1),
        "conv2_w": unif(ks[2], (c2, c1, k2, k2), c1 * k2 * k2),
        "conv2_b": unif(ks[3], (c2,), c1 * k2 * k2),
        "fc_w": unif(ks[4], (conv_out_size, fc_size), conv_out_size),
        "fc_b": unif(ks[5], (fc_size,), conv_out_size),
        # stored pre-transposed: (in, 4H) and (H, 4H); bias = b_ih + b_hh combined
        "lstm_w_ih": unif(ks[6], (lstm_in, 4 * lstm_size), lstm_size),
        "lstm_w_hh": unif(ks[7], (lstm_size, 4 * lstm_size), lstm_size),
        "lstm_b": unif(ks[8], (4 * lstm_size,), lstm_size),
        "pi_w": unif(ks[9], (lstm_size, output_size), lstm_size),
        "pi_b": unif(ks[10], (output_size,), lstm_size),
        "v_w": unif(ks[11], (lstm_size, 1), lstm_size),
        "v_b": jnp.zeros((1,), jnp.float32),
    }


def prepare_params(params, output_size):
    """One-time re-layout of PyTorch-style params into kernel-friendly form."""
    assert output_size + 1 <= HEAD_W
    fc_size = params["fc_w"].shape[1]
    H = params["lstm_w_hh"].shape[0]
    oc1 = params["conv1_w"].shape[0]
    oc2 = params["conv2_w"].shape[0]

    wih = params["lstm_w_ih"]                                  # (fc+A+1, 4H)
    w_heads = jnp.zeros((H, HEAD_W), jnp.float32)
    w_heads = w_heads.at[:, :output_size].set(params["pi_w"])
    w_heads = w_heads.at[:, output_size:output_size + 1].set(params["v_w"])
    b_heads = jnp.zeros((1, HEAD_W), jnp.float32)
    b_heads = b_heads.at[0, :output_size].set(params["pi_b"])
    b_heads = b_heads.at[0, output_size].set(params["v_b"][0])

    return {
        "w1": params["conv1_w"].reshape(oc1, -1).astype(jnp.bfloat16),   # (OC1, K1)
        "b1": params["conv1_b"].reshape(-1, 1),                           # (OC1, 1)
        "w2": params["conv2_w"].reshape(oc2, -1).T.astype(jnp.bfloat16),  # (K2, OC2)
        "b2": params["conv2_b"].reshape(1, -1),
        "fc_w": params["fc_w"].astype(jnp.bfloat16),
        "fc_b": params["fc_b"].reshape(1, -1),
        "wih_fc": wih[:fc_size].astype(jnp.bfloat16),          # fc-part of W_ih
        "wih_ex": wih[fc_size:],                               # action/reward part (f32)
        "whh": params["lstm_w_hh"].astype(jnp.bfloat16),
        "lstm_b": params["lstm_b"].reshape(1, -1),
        "w_heads": w_heads.astype(jnp.bfloat16),
        "b_heads": b_heads,
    }


# -----------------------------------------------------------------------------
# Full forward (2 pallas_calls + thin XLA glue), jitted
# -----------------------------------------------------------------------------
@functools.partial(jax.jit, static_argnames=("output_size",))
def atari_lstm_forward(prep, image_u8, prev_action, prev_reward, h0, c0, *,
                       output_size):
    T, B = image_u8.shape[:2]
    TB = T * B
    H = h0.shape[-1]
    x_u8 = image_u8.reshape(TB, *image_u8.shape[2:])           # (TB, C, H, W) uint8

    # --- conv1 (kernel A): im2col in glue (uint8), scale/bias/ReLU in kernel ---
    k1 = KERNELS[0]
    p1, OH1, OW1 = im2col_km(x_u8, k1, k1, STRIDES[0], PADDINGS[0])
    p1 = p1.astype(jnp.bfloat16)                               # raw 0..255 values, exact
    y1 = conv1_pallas(p1, prep["w1"], prep["b1"])              # (OC1, TB*OH1*OW1) bf16
    OC1 = prep["w1"].shape[0]
    conv1_nchw = y1.reshape(OC1, TB, OH1, OW1).transpose(1, 0, 2, 3)

    # --- conv2 patches in glue; its matmul is folded into the fused kernel ---
    k2 = KERNELS[1]
    p2, OH2, OW2 = im2col_mk(conv1_nchw, k2, k2, STRIDES[1], PADDINGS[1])
    # The fused kernel treats conv2 as a dense layer per sample; that equals the
    # NCHW flatten the reference model does only when the conv2 spatial output
    # is 1x1 (true for the 16x16 toy config).  TODO(synk): generalize.
    assert OH2 == 1 and OW2 == 1, "fused path assumes conv2 spatial output 1x1"
    p2 = p2.astype(jnp.bfloat16)                               # (TB, K2)

    # --- action/reward extras for the LSTM input ---
    extra = jnp.concatenate(
        [prev_action.reshape(T, B, -1).astype(jnp.float32),
         prev_reward.reshape(T, B, 1).astype(jnp.float32)], axis=2).reshape(TB, -1)

    # --- fused conv2 + fc + LSTM + pi/v heads (kernel B) ---
    head_out, hn, cn = fused_pallas(p2, prep, extra, h0, c0,
                                    T=T, B=B, H=H, A=output_size)

    head_out = head_out.reshape(T, B, HEAD_W)
    pi = head_out[:, :, :output_size]                          # (T, B, A)
    v = head_out[:, :, output_size]                            # (T, B)
    # next_rnn_state = (h, c) with torch's (num_layers=1, B, H) leading axis
    return pi, v, (hn[None], cn[None])


if __name__ == "__main__":
    # Config consistent with the module:
    # image_shape=(4,16,16), channels=[16,32], kernels=[8,4], strides=[4,2],
    # paddings=[0,1] -> conv output 32*1*1 = 32; fc=32, lstm=32, actions=6, T=8, B=2.
    T, B = 8, 2
    C, Himg, Wimg = 4, 16, 16
    output_size = 6
    fc_size = 32
    lstm_size = 32
    conv_out_size = 32 * 1 * 1

    key = jax.random.PRNGKey(0)
    kp, ki, ka, kr = jax.random.split(key, 4)

    params = make_params(kp, C, CHANNELS, KERNELS, conv_out_size,
                         fc_size, lstm_size, output_size)
    prep = prepare_params(params, output_size)

    image = jax.random.randint(ki, (T, B, C, Himg, Wimg), 0, 256, jnp.uint8)
    act_idx = jax.random.randint(ka, (T, B), 0, output_size)
    prev_action = jax.nn.one_hot(act_idx, output_size, dtype=jnp.float32)   # (T,B,A)
    prev_reward = jax.random.normal(kr, (T, B), jnp.float32)
    h0 = jnp.zeros((B, lstm_size), jnp.float32)
    c0 = jnp.zeros((B, lstm_size), jnp.float32)

    pi, v, (hn, cn) = atari_lstm_forward(prep, image, prev_action, prev_reward,
                                         h0, c0, output_size=output_size)
    jax.block_until_ready((pi, v, hn, cn))

    assert pi.shape == (T, B, output_size)
    assert v.shape == (T, B)
    assert hn.shape == (1, B, lstm_size) and cn.shape == (1, B, lstm_size)
    assert bool(jnp.all(jnp.isfinite(pi))) and bool(jnp.all(jnp.isfinite(v)))
    # approx reciprocal in the softmax denominator -> allow ~2^-12 rel. error
    assert bool(jnp.all(jnp.abs(pi.sum(-1) - 1.0) < 5e-3))

    print("KERNEL_OK")
</pallas_src>

<mosaic_0001>
module attributes {stable_mosaic.version = 11 : i64} {
  func.func @_conv1_kernel(%arg0: memref<256x144xbf16, #tpu.memory_space<vmem>>, %arg1: memref<16x256xbf16, #tpu.memory_space<vmem>>, %arg2: memref<16x1xf32, #tpu.memory_space<vmem>>, %arg3: memref<16x144xbf16, #tpu.memory_space<vmem>>) attributes {dimension_semantics = [], scalar_prefetch = 0 : i64, scratch_operands = 0 : i64, tpu.core_type = #tpu.core_type<tc>} {
    %c0 = arith.constant 0 : index
    %c0_0 = arith.constant 0 : index
    %0 = vector.load %arg1[%c0, %c0_0] : memref<16x256xbf16, #tpu.memory_space<vmem>>, vector<16x256xbf16>
    %c0_1 = arith.constant 0 : index
    %c0_2 = arith.constant 0 : index
    %1 = vector.load %arg0[%c0_1, %c0_2] : memref<256x144xbf16, #tpu.memory_space<vmem>>, vector<256x144xbf16>
    %cst = arith.constant dense<0.000000e+00> : vector<16x144xf32>
    %2 = tpu.matmul %0, %1, %cst {dimension_numbers = #tpu.dot_dimension_numbers<[1], [0], [0], [1], [0, 0, 1, 1], [], []>} : vector<16x256xbf16>, vector<256x144xbf16>, vector<16x144xf32> -> vector<16x144xf32>
    %cst_3 = arith.constant 0.00392156886 : f32
    %3 = vector.broadcast %cst_3 : f32 to vector<16x144xf32>
    %4 = arith.mulf %2, %3 : vector<16x144xf32>
    %c0_4 = arith.constant 0 : index
    %c0_5 = arith.constant 0 : index
    %5 = vector.load %arg2[%c0_4, %c0_5] : memref<16x1xf32, #tpu.memory_space<vmem>>, vector<16x1xf32>
    %6 = vector.broadcast %5 : vector<16x1xf32> to vector<16x144xf32>
    %7 = arith.addf %4, %6 : vector<16x144xf32>
    %cst_6 = arith.constant 0.000000e+00 : f32
    %8 = vector.broadcast %cst_6 : f32 to vector<16x144xf32>
    %9 = arith.maximumf %7, %8 : vector<16x144xf32>
    %10 = arith.truncf %9 : vector<16x144xf32> to vector<16x144xbf16>
    %c0_7 = arith.constant 0 : index
    %c0_8 = arith.constant 0 : index
    %11 = vector.load %arg3[%c0_7, %c0_8] : memref<16x144xbf16, #tpu.memory_space<vmem>>, vector<16x144xbf16>
    tpu.vector_store %arg3[%c0_7, %c0_8], %10 {strides = array<i32>} : memref<16x144xbf16, #tpu.memory_space<vmem>>, vector<16x144xbf16>,
    return
  }
}

module attributes {stable_mosaic.version = 11 : i64} {
  func.func @_fused_kernel(%arg0: memref<16x256xbf16, #tpu.memory_space<vmem>>, %arg1: memref<256x32xbf16, #tpu.memory_space<vmem>>, %arg2: memref<1x32xf32, #tpu.memory_space<vmem>>, %arg3: memref<32x32xbf16, #tpu.memory_space<vmem>>, %arg4: memref<1x32xf32, #tpu.memory_space<vmem>>, %arg5: memref<32x128xbf16, #tpu.memory_space<vmem>>, %arg6: memref<7x128xf32, #tpu.memory_space<vmem>>, %arg7: memref<32x128xbf16, #tpu.memory_space<vmem>>, %arg8: memref<1x128xf32, #tpu.memory_space<vmem>>, %arg9: memref<16x7xf32, #tpu.memory_space<vmem>>, %arg10: memref<2x32xf32, #tpu.memory_space<vmem>>, %arg11: memref<2x32xf32, #tpu.memory_space<vmem>>, %arg12: memref<32x128xbf16, #tpu.memory_space<vmem>>, %arg13: memref<1x128xf32, #tpu.memory_space<vmem>>, %arg14: memref<16x128xf32, #tpu.memory_space<vmem>>, %arg15: memref<2x32xf32, #tpu.memory_space<vmem>>, %arg16: memref<2x32xf32, #tpu.memory_space<vmem>>, %arg17: memref<16x32xf32, #tpu.memory_space<vmem>>) attributes {dimension_semantics = [], scalar_prefetch = 0 : i64, scratch_operands = 1 : i64, tpu.core_type = #tpu.core_type<tc>} {
    %c0 = arith.constant 0 : index
    %c0_0 = arith.constant 0 : index
    %0 = vector.load %arg0[%c0, %c0_0] : memref<16x256xbf16, #tpu.memory_space<vmem>>, vector<16x256xbf16>
    %c0_1 = arith.constant 0 : index
    %c0_2 = arith.constant 0 : index
    %1 = vector.load %arg1[%c0_1, %c0_2] : memref<256x32xbf16, #tpu.memory_space<vmem>>, vector<256x32xbf16>
    %cst = arith.constant dense<0.000000e+00> : vector<16x32xf32>
    %2 = tpu.matmul %0, %1, %cst {dimension_numbers = #tpu.dot_dimension_numbers<[1], [0], [0], [1], [0, 0, 1, 1], [], []>} : vector<16x256xbf16>, vector<256x32xbf16>, vector<16x32xf32> -> vector<16x32xf32>
    %c0_3 = arith.constant 0 : index
    %c0_4 = arith.constant 0 : index
    %3 = vector.load %arg2[%c0_3, %c0_4] : memref<1x32xf32, #tpu.memory_space<vmem>>, vector<1x32xf32>
    %4 = vector.broadcast %3 : vector<1x32xf32> to vector<16x32xf32>
    %5 = arith.addf %2, %4 : vector<16x32xf32>
    %cst_5 = arith.constant 0.000000e+00 : f32
    %6 = vector.broadcast %cst_5 : f32 to vector<16x32xf32>
    %7 = arith.maximumf %5, %6 : vector<16x32xf32>
    %8 = arith.truncf %7 : vector<16x32xf32> to vector<16x32xbf16>
    %c0_6 = arith.constant 0 : index
    %c0_7 = arith.constant 0 : index
    %9 = vector.load %arg3[%c0_6, %c0_7] : memref<32x32xbf16, #tpu.memory_space<vmem>>, vector<32x32xbf16>
    %cst_8 = arith.constant dense<0.000000e+00> : vector<16x32xf32>
    %10 = tpu.matmul %8, %9, %cst_8 {dimension_numbers = #tpu.dot_dimension_numbers<[1], [0], [0], [1], [0, 0, 1, 1], [], []>} : vector<16x32xbf16>, vector<32x32xbf16>, vector<16x32xf32> -> vector<16x32xf32>
    %c0_9 = arith.constant 0 : index
    %c0_10 = arith.constant 0 : index
    %11 = vector.load %arg4[%c0_9, %c0_10] : memref<1x32xf32, #tpu.memory_space<vmem>>, vector<1x32xf32>
    %12 = vector.broadcast %11 : vector<1x32xf32> to vector<16x32xf32>
    %13 = arith.addf %10, %12 : vector<16x32xf32>
    %cst_11 = arith.constant 0.000000e+00 : f32
    %14 = vector.broadcast %cst_11 : f32 to vector<16x32xf32>
    %15 = arith.maximumf %13, %14 : vector<16x32xf32>
    %16 = arith.truncf %15 : vector<16x32xf32> to vector<16x32xbf16>
    %c0_12 = arith.constant 0 : index
    %c0_13 = arith.constant 0 : index
    %17 = vector.load %arg5[%c0_12, %c0_13] : memref<32x128xbf16, #tpu.memory_space<vmem>>, vector<32x128xbf16>
    %cst_14 = arith.constant dense<0.000000e+00> : vector<16x128xf32>
    %18 = tpu.matmul %16, %17, %cst_14 {dimension_numbers = #tpu.dot_dimension_numbers<[1], [0], [0], [1], [0, 0, 1, 1], [], []>} : vector<16x32xbf16>, vector<32x128xbf16>, vector<16x128xf32> -> vector<16x128xf32>
    %c0_15 = arith.constant 0 : index
    %c0_16 = arith.constant 0 : index
    %19 = vector.load %arg9[%c0_15, %c0_16] : memref<16x7xf32, #tpu.memory_space<vmem>>, vector<16x7xf32>
    %c0_17 = arith.constant 0 : index
    %c0_18 = arith.constant 0 : index
    %20 = vector.load %arg6[%c0_17, %c0_18] : memref<7x128xf32, #tpu.memory_space<vmem>>, vector<7x128xf32>
    %cst_19 = arith.constant dense<0.000000e+00> : vector<16x128xf32>
    %21 = tpu.matmul %19, %20, %cst_19 {dimension_numbers = #tpu.dot_dimension_numbers<[1], [0], [0], [1], [0, 0, 1, 1], [], []>} : vector<16x7xf32>, vector<7x128xf32>, vector<16x128xf32> -> vector<16x128xf32>
    %22 = arith.addf %18, %21 : vector<16x128xf32>
    %c0_20 = arith.constant 0 : index
    %c0_21 = arith.constant 0 : index
    %23 = vector.load %arg8[%c0_20, %c0_21] : memref<1x128xf32, #tpu.memory_space<vmem>>, vector<1x128xf32>
    %24 = vector.broadcast %23 : vector<1x128xf32> to vector<16x128xf32>
    %25 = arith.addf %22, %24 : vector<16x128xf32>
    %c0_22 = arith.constant 0 : index
    %c0_23 = arith.constant 0 : index
    %26 = vector.load %arg10[%c0_22, %c0_23] : memref<2x32xf32, #tpu.memory_space<vmem>>, vector<2x32xf32>
    %c0_24 = arith.constant 0 : index
    %c0_25 = arith.constant 0 : index
    %27 = vector.load %arg11[%c0_24, %c0_25] : memref<2x32xf32, #tpu.memory_space<vmem>>, vector<2x32xf32>
    %28 = vector.extract_strided_slice %25 {offsets = [0, 0], sizes = [2, 128], strides = [1, 1]} : vector<16x128xf32> to vector<2x128xf32>
    %29 = arith.truncf %26 : vector<2x32xf32> to vector<2x32xbf16>
    %c0_26 = arith.constant 0 : index
    %c0_27 = arith.constant 0 : index
    %30 = vector.load %arg7[%c0_26, %c0_27] : memref<32x128xbf16, #tpu.memory_space<vmem>>, vector<32x128xbf16>
    %cst_28 = arith.constant dense<0.000000e+00> : vector<2x128xf32>
    %31 = tpu.matmul %29, %30, %cst_28 {dimension_numbers = #tpu.dot_dimension_numbers<[1], [0], [0], [1], [0, 0, 1, 1], [], []>} : vector<2x32xbf16>, vector<32x128xbf16>, vector<2x128xf32> -> vector<2x128xf32>
    %32 = arith.addf %28, %31 : vector<2x128xf32>
    %33 = vector.extract_strided_slice %32 {offsets = [0, 0], sizes = [2, 32], strides = [1, 1]} : vector<2x128xf32> to vector<2x32xf32>
    %34 = arith.negf %33 : vector<2x32xf32>
    %35 = math.exp %34 : vector<2x32xf32>
    %cst_29 = arith.constant 1.000000e+00 : f32
    %36 = vector.broadcast %cst_29 : f32 to vector<2x32xf32>
    %37 = arith.addf %36, %35 : vector<2x32xf32>
    %38 = arith.divf %36, %37 : vector<2x32xf32>
    %39 = vector.extract_strided_slice %32 {offsets = [0, 32], sizes = [2, 32], strides = [1, 1]} : vector<2x128xf32> to vector<2x32xf32>
    %40 = arith.negf %39 : vector<2x32xf32>
    %41 = math.exp %40 : vector<2x32xf32>
    %cst_30 = arith.constant 1.000000e+00 : f32
    %42 = vector.broadcast %cst_30 : f32 to vector<2x32xf32>
    %43 = arith.addf %42, %41 : vector<2x32xf32>
    %44 = arith.divf %42, %43 : vector<2x32xf32>
    %45 = vector.extract_strided_slice %32 {offsets = [0, 64], sizes = [2, 32], strides = [1, 1]} : vector<2x128xf32> to vector<2x32xf32>
    %46 = math.tanh %45 : vector<2x32xf32>
    %47 = vector.extract_strided_slice %32 {offsets = [0, 96], sizes = [2, 32], strides = [1, 1]} : vector<2x128xf32> to vector<2x32xf32>
    %48 = arith.negf %47 : vector<2x32xf32>
    %49 = math.exp %48 : vector<2x32xf32>
    %cst_31 = arith.constant 1.000000e+00 : f32
    %50 = vector.broadcast %cst_31 : f32 to vector<2x32xf32>
    %51 = arith.addf %50, %49 : vector<2x32xf32>
    %52 = arith.divf %50, %51 : vector<2x32xf32>
    %53 = arith.mulf %44, %27 : vector<2x32xf32>
    %54 = arith.mulf %38, %46 : vector<2x32xf32>
    %55 = arith.addf %53, %54 : vector<2x32xf32>
    %56 = math.tanh %55 : vector<2x32xf32>
    %57 = arith.mulf %52, %56 : vector<2x32xf32>
    %c0_32 = arith.constant 0 : index
    %c0_33 = arith.constant 0 : index
    %58 = vector.load %arg17[%c0_32, %c0_33] : memref<16x32xf32, #tpu.memory_space<vmem>>, vector<2x32xf32>
    tpu.vector_store %arg17[%c0_32, %c0_33], %57 {strides = array<i32>} : memref<16x32xf32, #tpu.memory_space<vmem>>, vector<2x32xf32>,
    %59 = vector.extract_strided_slice %25 {offsets = [2, 0], sizes = [2, 128], strides = [1, 1]} : vector<16x128xf32> to vector<2x128xf32>
    %60 = arith.truncf %57 : vector<2x32xf32> to vector<2x32xbf16>
    %c0_34 = arith.constant 0 : index
    %c0_35 = arith.constant 0 : index
    %61 = vector.load %arg7[%c0_34, %c0_35] : memref<32x128xbf16, #tpu.memory_space<vmem>>, vector<32x128xbf16>
    %cst_36 = arith.constant dense<0.000000e+00> : vector<2x128xf32>
    %62 = tpu.matmul %60, %61, %cst_36 {dimension_numbers = #tpu.dot_dimension_numbers<[1], [0], [0], [1], [0, 0, 1, 1], [], []>} : vector<2x32xbf16>, vector<32x128xbf16>, vector<2x128xf32> -> vector<2x128xf32>
    %63 = arith.addf %59, %62 : vector<2x128xf32>
    %64 = vector.extract_strided_slice %63 {offsets = [0, 0], sizes = [2, 32], strides = [1, 1]} : vector<2x128xf32> to vector<2x32xf32>
    %65 = arith.negf %64 : vector<2x32xf32>
    %66 = math.exp %65 : vector<2x32xf32>
    %cst_37 = arith.constant 1.000000e+00 : f32
    %67 = vector.broadcast %cst_37 : f32 to vector<2x32xf32>
    %68 = arith.addf %67, %66 : vector<2x32xf32>
    %69 = arith.divf %67, %68 : vector<2x32xf32>
    %70 = vector.extract_strided_slice %63 {offsets = [0, 32], sizes = [2, 32], strides = [1, 1]} : vector<2x128xf32> to vector<2x32xf32>
    %71 = arith.negf %70 : vector<2x32xf32>
    %72 = math.exp %71 : vector<2x32xf32>
    %cst_38 = arith.constant 1.000000e+00 : f32
    %73 = vector.broadcast %cst_38 : f32 to vector<2x32xf32>
    %74 = arith.addf %73, %72 : vector<2x32xf32>
    %75 = arith.divf %73, %74 : vector<2x32xf32>
    %76 = vector.extract_strided_slice %63 {offsets = [0, 64], sizes = [2, 32], strides = [1, 1]} : vector<2x128xf32> to vector<2x32xf32>
    %77 = math.tanh %76 : vector<2x32xf32>
    %78 = vector.extract_strided_slice %63 {offsets = [0, 96], sizes = [2, 32], strides = [1, 1]} : vector<2x128xf32> to vector<2x32xf32>
    %79 = arith.negf %78 : vector<2x32xf32>
    %80 = math.exp %79 : vector<2x32xf32>
    %cst_39 = arith.constant 1.000000e+00 : f32
    %81 = vector.broadcast %cst_39 : f32 to vector<2x32xf32>
    %82 = arith.addf %81, %80 : vector<2x32xf32>
    %83 = arith.divf %81, %82 : vector<2x32xf32>
    %84 = arith.mulf %75, %55 : vector<2x32xf32>
    %85 = arith.mulf %69, %77 : vector<2x32xf32>
    %86 = arith.addf %84, %85 : vector<2x32xf32>
    %87 = math.tanh %86 : vector<2x32xf32>
    %88 = arith.mulf %83, %87 : vector<2x32xf32>
    %c2 = arith.constant 2 : index
    %c0_40 = arith.constant 0 : index
    %89 = vector.load %arg17[%c2, %c0_40] : memref<16x32xf32, #tpu.memory_space<vmem>>, vector<2x32xf32>
    tpu.vector_store %arg17[%c2, %c0_40], %88 {strides = array<i32>} : memref<16x32xf32, #tpu.memory_space<vmem>>, vector<2x32xf32>,
    %90 = vector.extract_strided_slice %25 {offsets = [4, 0], sizes = [2, 128], strides = [1, 1]} : vector<16x128xf32> to vector<2x128xf32>
    %91 = arith.truncf %88 : vector<2x32xf32> to vector<2x32xbf16>
    %c0_41 = arith.constant 0 : index
    %c0_42 = arith.constant 0 : index
    %92 = vector.load %arg7[%c0_41, %c0_42] : memref<32x128xbf16, #tpu.memory_space<vmem>>, vector<32x128xbf16>
    %cst_43 = arith.constant dense<0.000000e+00> : vector<2x128xf32>
    %93 = tpu.matmul %91, %92, %cst_43 {dimension_numbers = #tpu.dot_dimension_numbers<[1], [0], [0], [1], [0, 0, 1, 1], [], []>} : vector<2x32xbf16>, vector<32x128xbf16>, vector<2x128xf32> -> vector<2x128xf32>
    %94 = arith.addf %90, %93 : vector<2x128xf32>
    %95 = vector.extract_strided_slice %94 {offsets = [0, 0], sizes = [2, 32], strides = [1, 1]} : vector<2x128xf32> to vector<2x32xf32>
    %96 = arith.negf %95 : vector<2x32xf32>
    %97 = math.exp %96 : vector<2x32xf32>
    %cst_44 = arith.constant 1.000000e+00 : f32
    %98 = vector.broadcast %cst_44 : f32 to vector<2x32xf32>
    %99 = arith.addf %98, %97 : vector<2x32xf32>
    %100 = arith.divf %98, %99 : vector<2x32xf32>
    %101 = vector.extract_strided_slice %94 {offsets = [0, 32], sizes = [2, 32], strides = [1, 1]} : vector<2x128xf32> to vector<2x32xf32>
    %102 = arith.negf %101 : vector<2x32xf32>
    %103 = math.exp %102 : vector<2x32xf32>
    %cst_45 = arith.constant 1.000000e+00 : f32
    %104 = vector.broadcast %cst_45 : f32 to vector<2x32xf32>
    %105 = arith.addf %104, %103 : vector<2x32xf32>
    %106 = arith.divf %104, %105 : vector<2x32xf32>
    %107 = vector.extract_strided_slice %94 {offsets = [0, 64], sizes = [2, 32], strides = [1, 1]} : vector<2x128xf32> to vector<2x32xf32>
    %108 = math.tanh %107 : vector<2x32xf32>
    %109 = vector.extract_strided_slice %94 {offsets = [0, 96], sizes = [2, 32], strides = [1, 1]} : vector<2x128xf32> to vector<2x32xf32>
    %110 = arith.negf %109 : vector<2x32xf32>
    %111 = math.exp %110 : vector<2x32xf32>
    %cst_46 = arith.constant 1.000000e+00 : f32
    %112 = vector.broadcast %cst_46 : f32 to vector<2x32xf32>
    %113 = arith.addf %112, %111 : vector<2x32xf32>
    %114 = arith.divf %112, %113 : vector<2x32xf32>
    %115 = arith.mulf %106, %86 : vector<2x32xf32>
    %116 = arith.mulf %100, %108 : vector<2x32xf32>
    %117 = arith.addf %115, %116 : vector<2x32xf32>
    %118 = math.tanh %117 : vector<2x32xf32>
    %119 = arith.mulf %114, %118 : vector<2x32xf32>
    %c4 = arith.constant 4 : index
    %c0_47 = arith.constant 0 : index
    %120 = vector.load %arg17[%c4, %c0_47] : memref<16x32xf32, #tpu.memory_space<vmem>>, vector<2x32xf32>
    tpu.vector_store %arg17[%c4, %c0_47], %119 {strides = array<i32>} : memref<16x32xf32, #tpu.memory_space<vmem>>, vector<2x32xf32>,
    %121 = vector.extract_strided_slice %25 {offsets = [6, 0], sizes = [2, 128], strides = [1, 1]} : vector<16x128xf32> to vector<2x128xf32>
    %122 = arith.truncf %119 : vector<2x32xf32> to vector<2x32xbf16>
    %c0_48 = arith.constant 0 : index
    %c0_49 = arith.constant 0 : index
    %123 = vector.load %arg7[%c0_48, %c0_49] : memref<32x128xbf16, #tpu.memory_space<vmem>>, vector<32x128xbf16>
    %cst_50 = arith.constant dense<0.000000e+00> : vector<2x128xf32>
    %124 = tpu.matmul %122, %123, %cst_50 {dimension_numbers = #tpu.dot_dimension_numbers<[1], [0], [0], [1], [0, 0, 1, 1], [], []>} : vector<2x32xbf16>, vector<32x128xbf16>, vector<2x128xf32> -> vector<2x128xf32>
    %125 = arith.addf %121, %124 : vector<2x128xf32>
    %126 = vector.extract_strided_slice %125 {offsets = [0, 0], sizes = [2, 32], strides = [1, 1]} : vector<2x128xf32> to vector<2x32xf32>
    %127 = arith.negf %126 : vector<2x32xf32>
    %128 = math.exp %127 : vector<2x32xf32>
    %cst_51 = arith.constant 1.000000e+00 : f32
    %129 = vector.broadcast %cst_51 : f32 to vector<2x32xf32>
    %130 = arith.addf %129, %128 : vector<2x32xf32>
    %131 = arith.divf %129, %130 : vector<2x32xf32>
    %132 = vector.extract_strided_slice %125 {offsets = [0, 32], sizes = [2, 32], strides = [1, 1]} : vector<2x128xf32> to vector<2x32xf32>
    %133 = arith.negf %132 : vector<2x32xf32>
    %134 = math.exp %133 : vector<2x32xf32>
    %cst_52 = arith.constant 1.000000e+00 : f32
    %135 = vector.broadcast %cst_52 : f32 to vector<2x32xf32>
    %136 = arith.addf %135, %134 : vector<2x32xf32>
    %137 = arith.divf %135, %136 : vector<2x32xf32>
    %138 = vector.extract_strided_slice %125 {offsets = [0, 64], sizes = [2, 32], strides = [1, 1]} : vector<2x128xf32> to vector<2x32xf32>
    %139 = math.tanh %138 : vector<2x32xf32>
    %140 = vector.extract_strided_slice %125 {offsets = [0, 96], sizes = [2, 32], strides = [1, 1]} : vector<2x128xf32> to vector<2x32xf32>
    %141 = arith.negf %140 : vector<2x32xf32>
    %142 = math.exp %141 : vector<2x32xf32>
    %cst_53 = arith.constant 1.000000e+00 : f32
    %143 = vector.broadcast %cst_53 : f32 to vector<2x32xf32>
    %144 = arith.addf %143, %142 : vector<2x32xf32>
    %145 = arith.divf %143, %144 : vector<2x32xf32>
    %146 = arith.mulf %137, %117 : vector<2x32xf32>
    %147 = arith.mulf %131, %139 : vector<2x32xf32>
    %148 = arith.addf %146, %147 : vector<2x32xf32>
    %149 = math.tanh %148 : vector<2x32xf32>
    %150 = arith.mulf %145, %149 : vector<2x32xf32>
    %c6 = arith.constant 6 : index
    %c0_54 = arith.constant 0 : index
    %151 = vector.load %arg17[%c6, %c0_54] : memref<16x32xf32, #tpu.memory_space<vmem>>, vector<2x32xf32>
    tpu.vector_store %arg17[%c6, %c0_54], %150 {strides = array<i32>} : memref<16x32xf32, #tpu.memory_space<vmem>>, vector<2x32xf32>,
    %152 = vector.extract_strided_slice %25 {offsets = [8, 0], sizes = [2, 128], strides = [1, 1]} : vector<16x128xf32> to vector<2x128xf32>
    %153 = arith.truncf %150 : vector<2x32xf32> to vector<2x32xbf16>
    %c0_55 = arith.constant 0 : index
    %c0_56 = arith.constant 0 : index
    %154 = vector.load %arg7[%c0_55, %c0_56] : memref<32x128xbf16, #tpu.memory_space<vmem>>, vector<32x128xbf16>
    %cst_57 = arith.constant dense<0.000000e+00> : vector<2x128xf32>
    %155 = tpu.matmul %153, %154, %cst_57 {dimension_numbers = #tpu.dot_dimension_numbers<[1], [0], [0], [1], [0, 0, 1, 1], [], []>} : vector<2x32xbf16>, vector<32x128xbf16>, vector<2x128xf32> -> vector<2x128xf32>
    %156 = arith.addf %152, %155 : vector<2x128xf32>
    %157 = vector.extract_strided_slice %156 {offsets = [0, 0], sizes = [2, 32], strides = [1, 1]} : vector<2x128xf32> to vector<2x32xf32>
    %158 = arith.negf %157 : vector<2x32xf32>
    %159 = math.exp %158 : vector<2x32xf32>
    %cst_58 = arith.constant 1.000000e+00 : f32
    %160 = vector.broadcast %cst_58 : f32 to vector<2x32xf32>
    %161 = arith.addf %160, %159 : vector<2x32xf32>
    %162 = arith.divf %160, %161 : vector<2x32xf32>
    %163 = vector.extract_strided_slice %156 {offsets = [0, 32], sizes = [2, 32], strides = [1, 1]} : vector<2x128xf32> to vector<2x32xf32>
    %164 = arith.negf %163 : vector<2x32xf32>
    %165 = math.exp %164 : vector<2x32xf32>
    %cst_59 = arith.constant 1.000000e+00 : f32
    %166 = vector.broadcast %cst_59 : f32 to vector<2x32xf32>
    %167 = arith.addf %166, %165 : vector<2x32xf32>
    %168 = arith.divf %166, %167 : vector<2x32xf32>
    %169 = vector.extract_strided_slice %156 {offsets = [0, 64], sizes = [2, 32], strides = [1, 1]} : vector<2x128xf32> to vector<2x32xf32>
    %170 = math.tanh %169 : vector<2x32xf32>
    %171 = vector.extract_strided_slice %156 {offsets = [0, 96], sizes = [2, 32], strides = [1, 1]} : vector<2x128xf32> to vector<2x32xf32>
    %172 = arith.negf %171 : vector<2x32xf32>
    %173 = math.exp %172 : vector<2x32xf32>
    %cst_60 = arith.constant 1.000000e+00 : f32
    %174 = vector.broadcast %cst_60 : f32 to vector<2x32xf32>
    %175 = arith.addf %174, %173 : vector<2x32xf32>
    %176 = arith.divf %174, %175 : vector<2x32xf32>
    %177 = arith.mulf %168, %148 : vector<2x32xf32>
    %178 = arith.mulf %162, %170 : vector<2x32xf32>
    %179 = arith.addf %177, %178 : vector<2x32xf32>
    %180 = math.tanh %179 : vector<2x32xf32>
    %181 = arith.mulf %176, %180 : vector<2x32xf32>
    %c8 = arith.constant 8 : index
    %c0_61 = arith.constant 0 : index
    %182 = vector.load %arg17[%c8, %c0_61] : memref<16x32xf32, #tpu.memory_space<vmem>>, vector<2x32xf32>
    tpu.vector_store %arg17[%c8, %c0_61], %181 {strides = array<i32>} : memref<16x32xf32, #tpu.memory_space<vmem>>, vector<2x32xf32>,
    %183 = vector.extract_strided_slice %25 {offsets = [10, 0], sizes = [2, 128], strides = [1, 1]} : vector<16x128xf32> to vector<2x128xf32>
    %184 = arith.truncf %181 : vector<2x32xf32> to vector<2x32xbf16>
    %c0_62 = arith.constant 0 : index
    %c0_63 = arith.constant 0 : index
    %185 = vector.load %arg7[%c0_62, %c0_63] : memref<32x128xbf16, #tpu.memory_space<vmem>>, vector<32x128xbf16>
    %cst_64 = arith.constant dense<0.000000e+00> : vector<2x128xf32>
    %186 = tpu.matmul %184, %185, %cst_64 {dimension_numbers = #tpu.dot_dimension_numbers<[1], [0], [0], [1], [0, 0, 1, 1], [], []>} : vector<2x32xbf16>, vector<32x128xbf16>, vector<2x128xf32> -> vector<2x128xf32>
    %187 = arith.addf %183, %186 : vector<2x128xf32>
    %188 = vector.extract_strided_slice %187 {offsets = [0, 0], sizes = [2, 32], strides = [1, 1]} : vector<2x128xf32> to vector<2x32xf32>
    %189 = arith.negf %188 : vector<2x32xf32>
    %190 = math.exp %189 : vector<2x32xf32>
    %cst_65 = arith.constant 1.000000e+00 : f32
    %191 = vector.broadcast %cst_65 : f32 to vector<2x32xf32>
    %192 = arith.addf %191, %190 : vector<2x32xf32>
    %193 = arith.divf %191, %192 : vector<2x32xf32>
    %194 = vector.extract_strided_slice %187 {offsets = [0, 32], sizes = [2, 32], strides = [1, 1]} : vector<2x128xf32> to vector<2x32xf32>
    %195 = arith.negf %194 : vector<2x32xf32>
    %196 = math.exp %195 : vector<2x32xf32>
    %cst_66 = arith.constant 1.000000e+00 : f32
    %197 = vector.broadcast %cst_66 : f32 to vector<2x32xf32>
    %198 = arith.addf %197, %196 : vector<2x32xf32>
    %199 = arith.divf %197, %198 : vector<2x32xf32>
    %200 = vector.extract_strided_slice %187 {offsets = [0, 64], sizes = [2, 32], strides = [1, 1]} : vector<2x128xf32> to vector<2x32xf32>
    %201 = math.tanh %200 : vector<2x32xf32>
    %202 = vector.extract_strided_slice %187 {offsets = [0, 96], sizes = [2, 32], strides = [1, 1]} : vector<2x128xf32> to vector<2x32xf32>
    %203 = arith.negf %202 : vector<2x32xf32>
    %204 = math.exp %203 : vector<2x32xf32>
    %cst_67 = arith.constant 1.000000e+00 : f32
    %205 = vector.broadcast %cst_67 : f32 to vector<2x32xf32>
    %206 = arith.addf %205, %204 : vector<2x32xf32>
    %207 = arith.divf %205, %206 : vector<2x32xf32>
    %208 = arith.mulf %199, %179 : vector<2x32xf32>
    %209 = arith.mulf %193, %201 : vector<2x32xf32>
    %210 = arith.addf %208, %209 : vector<2x32xf32>
    %211 = math.tanh %210 : vector<2x32xf32>
    %212 = arith.mulf %207, %211 : vector<2x32xf32>
    %c10 = arith.constant 10 : index
    %c0_68 = arith.constant 0 : index
    %213 = vector.load %arg17[%c10, %c0_68] : memref<16x32xf32, #tpu.memory_space<vmem>>, vector<2x32xf32>
    tpu.vector_store %arg17[%c10, %c0_68], %212 {strides = array<i32>} : memref<16x32xf32, #tpu.memory_space<vmem>>, vector<2x32xf32>,
    %214 = vector.extract_strided_slice %25 {offsets = [12, 0], sizes = [2, 128], strides = [1, 1]} : vector<16x128xf32> to vector<2x128xf32>
    %215 = arith.truncf %212 : vector<2x32xf32> to vector<2x32xbf16>
    %c0_69 = arith.constant 0 : index
    %c0_70 = arith.constant 0 : index
    %216 = vector.load %arg7[%c0_69, %c0_70] : memref<32x128xbf16, #tpu.memory_space<vmem>>, vector<32x128xbf16>
    %cst_71 = arith.constant dense<0.000000e+00> : vector<2x128xf32>
    %217 = tpu.matmul %215, %216, %cst_71 {dimension_numbers = #tpu.dot_dimension_numbers<[1], [0], [0], [1], [0, 0, 1, 1], [], []>} : vector<2x32xbf16>, vector<32x128xbf16>, vector<2x128xf32> -> vector<2x128xf32>
    %218 = arith.addf %214, %217 : vector<2x128xf32>
    %219 = vector.extract_strided_slice %218 {offsets = [0, 0], sizes = [2, 32], strides = [1, 1]} : vector<2x128xf32> to vector<2x32xf32>
    %220 = arith.negf %219 : vector<2x32xf32>
    %221 = math.exp %220 : vector<2x32xf32>
    %cst_72 = arith.constant 1.000000e+00 : f32
    %222 = vector.broadcast %cst_72 : f32 to vector<2x32xf32>
    %223 = arith.addf %222, %221 : vector<2x32xf32>
    %224 = arith.divf %222, %223 : vector<2x32xf32>
    %225 = vector.extract_strided_slice %218 {offsets = [0, 32], sizes = [2, 32], strides = [1, 1]} : vector<2x128xf32> to vector<2x32xf32>
    %226 = arith.negf %225 : vector<2x32xf32>
    %227 = math.exp %226 : vector<2x32xf32>
    %cst_73 = arith.constant 1.000000e+00 : f32
    %228 = vector.broadcast %cst_73 : f32 to vector<2x32xf32>
    %229 = arith.addf %228, %227 : vector<2x32xf32>
    %230 = arith.divf %228, %229 : vector<2x32xf32>
    %231 = vector.extract_strided_slice %218 {offsets = [0, 64], sizes = [2, 32], strides = [1, 1]} : vector<2x128xf32> to vector<2x32xf32>
    %232 = math.tanh %231 : vector<2x32xf32>
    %233 = vector.extract_strided_slice %218 {offsets = [0, 96], sizes = [2, 32], strides = [1, 1]} : vector<2x128xf32> to vector<2x32xf32>
    %234 = arith.negf %233 : vector<2x32xf32>
    %235 = math.exp %234 : vector<2x32xf32>
    %cst_74 = arith.constant 1.000000e+00 : f32
    %236 = vector.broadcast %cst_74 : f32 to vector<2x32xf32>
    %237 = arith.addf %236, %235 : vector<2x32xf32>
    %238 = arith.divf %236, %237 : vector<2x32xf32>
    %239 = arith.mulf %230, %210 : vector<2x32xf32>
    %240 = arith.mulf %224, %232 : vector<2x32xf32>
    %241 = arith.addf %239, %240 : vector<2x32xf32>
    %242 = math.tanh %241 : vector<2x32xf32>
    %243 = arith.mulf %238, %242 : vector<2x32xf32>
    %c12 = arith.constant 12 : index
    %c0_75 = arith.constant 0 : index
    %244 = vector.load %arg17[%c12, %c0_75] : memref<16x32xf32, #tpu.memory_space<vmem>>, vector<2x32xf32>
    tpu.vector_store %arg17[%c12, %c0_75], %243 {strides = array<i32>} : memref<16x32xf32, #tpu.memory_space<vmem>>, vector<2x32xf32>,
    %245 = vector.extract_strided_slice %25 {offsets = [14, 0], sizes = [2, 128], strides = [1, 1]} : vector<16x128xf32> to vector<2x128xf32>
    %246 = arith.truncf %243 : vector<2x32xf32> to vector<2x32xbf16>
    %c0_76 = arith.constant 0 : index
    %c0_77 = arith.constant 0 : index
    %247 = vector.load %arg7[%c0_76, %c0_77] : memref<32x128xbf16, #tpu.memory_space<vmem>>, vector<32x128xbf16>
    %cst_78 = arith.constant dense<0.000000e+00> : vector<2x128xf32>
    %248 = tpu.matmul %246, %247, %cst_78 {dimension_numbers = #tpu.dot_dimension_numbers<[1], [0], [0], [1], [0, 0, 1, 1], [], []>} : vector<2x32xbf16>, vector<32x128xbf16>, vector<2x128xf32> -> vector<2x128xf32>
    %249 = arith.addf %245, %248 : vector<2x128xf32>
    %250 = vector.extract_strided_slice %249 {offsets = [0, 0], sizes = [2, 32], strides = [1, 1]} : vector<2x128xf32> to vector<2x32xf32>
    %251 = arith.negf %250 : vector<2x32xf32>
    %252 = math.exp %251 : vector<2x32xf32>
    %cst_79 = arith.constant 1.000000e+00 : f32
    %253 = vector.broadcast %cst_79 : f32 to vector<2x32xf32>
    %254 = arith.addf %253, %252 : vector<2x32xf32>
    %255 = arith.divf %253, %254 : vector<2x32xf32>
    %256 = vector.extract_strided_slice %249 {offsets = [0, 32], sizes = [2, 32], strides = [1, 1]} : vector<2x128xf32> to vector<2x32xf32>
    %257 = arith.negf %256 : vector<2x32xf32>
    %258 = math.exp %257 : vector<2x32xf32>
    %cst_80 = arith.constant 1.000000e+00 : f32
    %259 = vector.broadcast %cst_80 : f32 to vector<2x32xf32>
    %260 = arith.addf %259, %258 : vector<2x32xf32>
    %261 = arith.divf %259, %260 : vector<2x32xf32>
    %262 = vector.extract_strided_slice %249 {offsets = [0, 64], sizes = [2, 32], strides = [1, 1]} : vector<2x128xf32> to vector<2x32xf32>
    %263 = math.tanh %262 : vector<2x32xf32>
    %264 = vector.extract_strided_slice %249 {offsets = [0, 96], sizes = [2, 32], strides = [1, 1]} : vector<2x128xf32> to vector<2x32xf32>
    %265 = arith.negf %264 : vector<2x32xf32>
    %266 = math.exp %265 : vector<2x32xf32>
    %cst_81 = arith.constant 1.000000e+00 : f32
    %267 = vector.broadcast %cst_81 : f32 to vector<2x32xf32>
    %268 = arith.addf %267, %266 : vector<2x32xf32>
    %269 = arith.divf %267, %268 : vector<2x32xf32>
    %270 = arith.mulf %261, %241 : vector<2x32xf32>
    %271 = arith.mulf %255, %263 : vector<2x32xf32>
    %272 = arith.addf %270, %271 : vector<2x32xf32>
    %273 = math.tanh %272 : vector<2x32xf32>
    %274 = arith.mulf %269, %273 : vector<2x32xf32>
    %c14 = arith.constant 14 : index
    %c0_82 = arith.constant 0 : index
    %275 = vector.load %arg17[%c14, %c0_82] : memref<16x32xf32, #tpu.memory_space<vmem>>, vector<2x32xf32>
    tpu.vector_store %arg17[%c14, %c0_82], %274 {strides = array<i32>} : memref<16x32xf32, #tpu.memory_space<vmem>>, vector<2x32xf32>,
    %c0_83 = arith.constant 0 : index
    %c0_84 = arith.constant 0 : index
    %276 = vector.load %arg17[%c0_83, %c0_84] : memref<16x32xf32, #tpu.memory_space<vmem>>, vector<16x32xf32>
    %277 = arith.truncf %276 : vector<16x32xf32> to vector<16x32xbf16>
    %c0_85 = arith.constant 0 : index
    %c0_86 = arith.constant 0 : index
    %278 = vector.load %arg12[%c0_85, %c0_86] : memref<32x128xbf16, #tpu.memory_space<vmem>>, vector<32x128xbf16>
    %cst_87 = arith.constant dense<0.000000e+00> : vector<16x128xf32>
    %279 = tpu.matmul %277, %278, %cst_87 {dimension_numbers = #tpu.dot_dimension_numbers<[1], [0], [0], [1], [0, 0, 1, 1], [], []>} : vector<16x32xbf16>, vector<32x128xbf16>, vector<16x128xf32> -> vector<16x128xf32>
    %c0_88 = arith.constant 0 : index
    %c0_89 = arith.constant 0 : index
    %280 = vector.load %arg13[%c0_88, %c0_89] : memref<1x128xf32, #tpu.memory_space<vmem>>, vector<1x128xf32>
    %281 = vector.broadcast %280 : vector<1x128xf32> to vector<16x128xf32>
    %282 = arith.addf %279, %281 : vector<16x128xf32>
    %283 = tpu.iota {dimensions = array<i32: 1>} : vector<16x128xi32>
    %c6_i32 = arith.constant 6 : i32
    %284 = vector.broadcast %c6_i32 : i32 to vector<16x128xi32>
    %285 = arith.cmpi slt, %283, %284 : vector<16x128xi32>
    %cst_90 = arith.constant 0xFF800000 : f32
    %286 = vector.broadcast %cst_90 : f32 to vector<16x128xf32>
    %287 = arith.select %285, %282, %286 : vector<16x128xi1>, vector<16x128xf32>
    %cst_91 = arith.constant dense<0xFF800000> : vector<16xf32>
    %288 = vector.multi_reduction <maximumf>, %287, %cst_91 [1] : vector<16x128xf32> to vector<16xf32>
    %289 = vector.shape_cast %288 : vector<16xf32> to vector<16x1xf32>
    %290 = vector.broadcast %289 : vector<16x1xf32> to vector<16x128xf32>
    %291 = arith.subf %287, %290 : vector<16x128xf32>
    %292 = math.exp %291 : vector<16x128xf32>
    %cst_92 = arith.constant dense<0.000000e+00> : vector<16xf32>
    %293 = vector.multi_reduction <add>, %292, %cst_92 [1] : vector<16x128xf32> to vector<16xf32>
    %294 = vector.shape_cast %293 : vector<16xf32> to vector<16x1xf32>
    %295 = tpu.reciprocal %294 {approx = true} : vector<16x1xf32> -> vector<16x1xf32>
    %296 = vector.broadcast %295 : vector<16x1xf32> to vector<16x128xf32>
    %297 = arith.mulf %292, %296 : vector<16x128xf32>
    %298 = arith.select %285, %297, %282 : vector<16x128xi1>, vector<16x128xf32>
    %c0_93 = arith.constant 0 : index
    %c0_94 = arith.constant 0 : index
    %299 = vector.load %arg14[%c0_93, %c0_94] : memref<16x128xf32, #tpu.memory_space<vmem>>, vector<16x128xf32>
    tpu.vector_store %arg14[%c0_93, %c0_94], %298 {strides = array<i32>} : memref<16x128xf32, #tpu.memory_space<vmem>>, vector<16x128xf32>,
    %c0_95 = arith.constant 0 : index
    %c0_96 = arith.constant 0 : index
    %300 = vector.load %arg15[%c0_95, %c0_96] : memref<2x32xf32, #tpu.memory_space<vmem>>, vector<2x32xf32>
    tpu.vector_store %arg15[%c0_95, %c0_96], %274 {strides = array<i32>} : memref<2x32xf32, #tpu.memory_space<vmem>>, vector<2x32xf32>,
    %c0_97 = arith.constant 0 : index
    %c0_98 = arith.constant 0 : index
    %301 = vector.load %arg16[%c0_97, %c0_98] : memref<2x32xf32, #tpu.memory_space<vmem>>, vector<2x32xf32>
    tpu.vector_store %arg16[%c0_97, %c0_98], %272 {strides = array<i32>} : memref<2x32xf32, #tpu.memory_space<vmem>>, vector<2x32xf32>,
    return
  }
}

</mosaic_0001>

<bundles_post_ra>
// kernel: atari_lstm_forward.2
= control target key start
LH: loop header
LB: loop body
LE: loop exit
PB: predicated region body
PF: predicated region fallthrough
CT: control target
= control target key end

     0   :  { %v397_v1 = vmov 0   ;;  %vm297_vm0 = vcmask 1043456   ;;  %vm298_vm1 = vcmask 130052   ;;  %s532_s0 = inlined_call_operand.vmem [shape: bf16[256,144], index: 0, kind: input, shape index: {}]   ;;  %s533_s1 = inlined_call_operand.vmem [shape: bf16[16,256], index: 1, kind: input, shape index: {}]   ;;  %s534_s2 = inlined_call_operand.vmem [shape: f32[16,1], index: 2, kind: input, shape index: {}]   ;;  %s535_s3 = inlined_call_operand.vmem [shape: bf16[16,144], index: 3, kind: output, shape index: {}]  }
   0x1   :  { %v346_v0 = vld [vmem:[%s532_s0 + $0x74] ss:$8 sps:$4 sm:$0xff]   ;;  %345 = vset.pattern.permute.xlu0 %v397_v1  ;;  %v348_v2 = vld [vmem:[%s532_s0 + $0x70] ss:$8 sps:$4 sm:$0xff]   ;;  %v349_v3 = vld [vmem:[%s532_s0 + $0x64] ss:$8 sps:$4 sm:$0xff]  }
   0x2   :  { %218 = vmatprep.subr.bf16.mxu0 %v346_v0  ;;  %v351_v4 = vld [vmem:[%s532_s0 + $0x60] ss:$8 sps:$4 sm:$0xff]   ;;  %v352_v5 = vld [vmem:[%s532_s0 + $0x54] ss:$8 sps:$4 sm:$0xff]   ;;  %v354_v6 = vld [vmem:[%s532_s0 + $0x50] ss:$8 sps:$4 sm:$0xff]  }
   0x3   :  { %219 = vmatpush1.bf16.msra.mxu0 %v348_v2  ;;  %v355_v7 = vld [vmem:[%s532_s0 + $0x44] ss:$8 sps:$4 sm:$0xff]   ;;  %v357_v8 = vld [vmem:[%s532_s0 + $0x40] ss:$8 sps:$4 sm:$0xff]   ;;  %v358_v9 = vld [vmem:[%s532_s0 + $0x34] ss:$8 sps:$4 sm:$0xff]  }
   0x4   :  { %220 = vmatprep.subr.bf16.mxu0 %v349_v3  ;;  %v360_v10 = vld [vmem:[%s532_s0 + $0x30] ss:$8 sps:$4 sm:$0xff]   ;;  %v361_v11 = vld [vmem:[%s532_s0 + $0x24] ss:$8 sps:$4 sm:$0xff]   ;;  %v363_v12 = vld [vmem:[%s532_s0 + $0x20] ss:$8 sps:$4 sm:$0xff]  }
   0x5   :  { %v364_v13 = vld [vmem:[%s532_s0 + $0x14] ss:$8 sps:$4 sm:$0xff]   ;;  %v396_v14 = vld [vmem:[%s533_s1 + $0x4] ss:$8 sps:$4 sm:$0xff]   ;;  %v366_v16 = vld [vmem:[%s532_s0 + $0x10] ss:$8 sps:$4 sm:$0xff]  }
   0x6   :  { %v265_v15 = vld [vmem:[%s534_s2] sm:$0xff]  ;;  %250 = vmatprep.mubr.bf16.mxu0 %v396_v14  ;;  %v266_v18 = vld [vmem:[%s534_s2 + $0x8] sm:$0xff]  ;;  %v370_v20 = vld [vmem:[%s532_s0 + $0xf4] ss:$8 sps:$4 sm:$0xff]  }
   0x7   :  { %221 = vmatpush1.bf16.msra.mxu0 %v351_v4  ;;  %269 = vperm.xlu0 %345, %v265_v15   ;;  %v367_v17 = vld [vmem:[%s532_s0 + $0x4] ss:$8 sps:$4 sm:$0xff]   ;;  %v369_v19 = vld [vmem:[%s532_s0] ss:$8 sps:$4 sm:$0xff]   ;;  %v372_v21 = vld [vmem:[%s532_s0 + $0xf0] ss:$8 sps:$4 sm:$0xff]  }
   0x8   :  { %222 = vmatprep.subr.bf16.mxu0 %v352_v5  ;;  %v373_v22 = vld [vmem:[%s532_s0 + $0xe4] ss:$8 sps:$4 sm:$0xff]   ;;  %v375_v23 = vld [vmem:[%s532_s0 + $0xe0] ss:$8 sps:$4 sm:$0xff]   ;;  %v376_v24 = vld [vmem:[%s532_s0 + $0xd4] ss:$8 sps:$4 sm:$0xff]  }
   0x9   :  { %v378_v25 = vld [vmem:[%s532_s0 + $0xd0] ss:$8 sps:$4 sm:$0xff]   ;;  %v379_v26 = vld [vmem:[%s532_s0 + $0xc4] ss:$8 sps:$4 sm:$0xff]   ;;  %v381_v27 = vld [vmem:[%s532_s0 + $0xc0] ss:$8 sps:$4 sm:$0xff]  }
   0xa   :  { %v382_v28 = vld [vmem:[%s532_s0 + $0xb4] ss:$8 sps:$4 sm:$0xff]   ;;  %v384_v29 = vld [vmem:[%s532_s0 + $0xb0] ss:$8 sps:$4 sm:$0xff]   ;;  %v385_v30 = vld [vmem:[%s532_s0 + $0xa4] ss:$8 sps:$4 sm:$0xff]  }
   0xb   :  { %223 = vmatpush1.bf16.msra.mxu0 %v354_v6  ;;  %274 = vperm.xlu0 %345, %v266_v18   ;;  %v387_v31 = vld [vmem:[%s532_s0 + $0xa0] ss:$8 sps:$4 sm:$0xff]   ;;  %v388_v32 = vld [vmem:[%s532_s0 + $0x94] ss:$8 sps:$4 sm:$0xff]   ;;  %v390_v33 = vld [vmem:[%s532_s0 + $0x90] ss:$8 sps:$4 sm:$0xff]  }
   0xc   :  { %224 = vmatprep.subr.bf16.mxu0 %v355_v7  ;;  %v391_v34 = vld [vmem:[%s532_s0 + $0x84] ss:$8 sps:$4 sm:$0xff]   ;;  %v393_v35 = vld [vmem:[%s532_s0 + $0x80] ss:$8 sps:$4 sm:$0xff]   ;;  %vm299_vm2 = vmor %vm298_vm1, %vm297_vm0 }
   0xd   :  { %v394_v36 = vld [vmem:[%s533_s1] ss:$8 sps:$4 sm:$0xff]  }
   0xf   :  { %225 = vmatpush1.bf16.msra.mxu0 %v357_v8 }
  0x10   :  { %226 = vmatprep.subr.bf16.mxu0 %v358_v9 }
  0x13   :  { %227 = vmatpush1.bf16.msra.mxu0 %v360_v10 }
  0x14   :  { %228 = vmatprep.subr.bf16.mxu0 %v361_v11 }
  0x17   :  { %229 = vmatpush1.bf16.msra.mxu0 %v363_v12 }
  0x18   :  { %230 = vmatprep.subr.bf16.mxu0 %v364_v13 }
  0x1b   :  { %231 = vmatpush1.bf16.msra.mxu0 %v366_v16 }
  0x1c   :  { %232 = vmatprep.subr.bf16.mxu0 %v367_v17 }
  0x1f   :  { %233 = vmatpush1.bf16.msra.mxu0 %v369_v19 }
  0x20   :  { %234 = vmatprep.subr.bf16.mxu0 %v370_v20 }
  0x23   :  { %235 = vmatpush2.bf16.msra.mxu0 %v372_v21 }
  0x24   :  { %236 = vmatprep.subr.bf16.mxu0 %v373_v22 }
  0x27   :  { %237 = vmatpush2.bf16.msra.mxu0 %v375_v23 }
  0x28   :  { %238 = vmatprep.subr.bf16.mxu0 %v376_v24 }
  0x2b   :  { %239 = vmatpush2.bf16.msra.mxu0 %v378_v25 }
  0x2c   :  { %240 = vmatprep.subr.bf16.mxu0 %v379_v26 }
  0x2f   :  { %241 = vmatpush2.bf16.msra.mxu0 %v381_v27 }
  0x30   :  { %242 = vmatprep.subr.bf16.mxu0 %v382_v28 }
  0x33   :  { %243 = vmatpush2.bf16.msra.mxu0 %v384_v29 }
  0x34   :  { %244 = vmatprep.subr.bf16.mxu0 %v385_v30 }
  0x37   :  { %245 = vmatpush2.bf16.msra.mxu0 %v387_v31 }
  0x38   :  { %246 = vmatprep.subr.bf16.mxu0 %v388_v32 }
  0x3b   :  { %247 = vmatpush2.bf16.msra.mxu0 %v390_v33 }
  0x3c   :  { %248 = vmatprep.subr.bf16.mxu0 %v391_v34 }
  0x3f   :  { %249 = vmatpush2.bf16.msra.mxu0 %v393_v35 }
  0x42   :  { %251 = vmatmul.mubr.bf16.vlgmr.msra.gmra.mxu0 %v394_v36 }
  0x82   :  { %v270_v37 = vpop.permute.xlu0 %269 }
  0x86   :  { %v275_v46 = vpop.permute.xlu0 %274 }
 0x102   :  { %v252_v38 = vpop.f32.mrf.mxu0 }
 0x103   :  { %v261_v39 = vmul.f32 0.003921569, %v252_v38 }
 0x104   :  { %v254_v40 = vpop.f32.mrf.mxu0 }
 0x105   :  { %v277_v41 = vadd.f32 %v270_v37, %v261_v39  ;;  %v262_v42 = vmul.f32 0.003921569, %v254_v40 }
 0x106   :  { %v256_v43 = vpop.f32.mrf.mxu0 }
 0x107   :  { %v278_v44 = vadd.f32 %v270_v37, %v262_v42  ;;  %v263_v45 = vmul.f32 0.003921569, %v256_v43  ;;  %v281_v48 = vmax.f32 %v277_v41, 0.0 }
 0x108   :  { %v258_v47 = vpop.f32.mrf.mxu0 }
 0x109   :  { %v282_v49 = vmax.f32 %v278_v44, 0.0  ;;  %v279_v50 = vadd.f32 %v275_v46, %v263_v45  ;;  %v264_v51 = vmul.f32 0.003921569, %v258_v47 }
 0x10b   :  { %v342_v52 = vpack.c.bf16 %v282_v49, %v281_v48  ;;  %v280_v53 = vadd.f32 %v275_v46, %v264_v51  ;;  %v283_v54 = vmax.f32 %v279_v50, 0.0 }
 0x10d   :  { %300 = vst.msk [vmem:[%s535_s3] sm:$0xff] %vm299_vm2, %v342_v52  ;;  %v284_v55 = vmax.f32 %v280_v53, 0.0 }
 0x10f   :  { %v343_v56 = vpack.c.bf16 %v284_v55, %v283_v54 }
 0x111   :  { %301 = vst.msk [vmem:[%s535_s3 + $0x8] sm:$0xff] %vm299_vm2, %v343_v56 }

// kernel: atari_lstm_forward.3
= control target key start
LH: loop header
LB: loop body
LE: loop exit
PB: predicated region body
PF: predicated region fallthrough
CT: control target
= control target key end

     0   :  { %s2189_s0 = inlined_call_operand.vmem [shape: bf16[16,256], index: 0, kind: input, shape index: {}]   ;;  %s2190_s1 = inlined_call_operand.vmem [shape: bf16[256,32], index: 1, kind: input, shape index: {}]   ;;  %s2191_s2 = inlined_call_operand.vmem [shape: f32[1,32], index: 2, kind: input, shape index: {}]   ;;  %s2192_s3 = inlined_call_operand.vmem [shape: bf16[32,32], index: 3, kind: input, shape index: {}]   ;;  %s2193_s4 = inlined_call_operand.vmem [shape: f32[1,32], index: 4, kind: input, shape index: {}]   ;;  %s2194_s5 = inlined_call_operand.vmem [shape: bf16[32,128], index: 5, kind: input, shape index: {}]   ;;  %s2195_s6 = inlined_call_operand.vmem [shape: f32[7,128], index: 6, kind: input, shape index: {}]   ;;  %s2196_s7 = inlined_call_operand.vmem [shape: bf16[32,128], index: 7, kind: input, shape index: {}]   ;;  %s2197_s8 = inlined_call_operand.vmem [shape: f32[1,128], index: 8, kind: input, shape index: {}]   ;;  %s2198_s9 = inlined_call_operand.vmem [shape: f32[16,7], index: 9, kind: input, shape index: {}]   ;;  %s2199_s10 = inlined_call_operand.vmem [shape: f32[2,32], index: 10, kind: input, shape index: {}]   ;;  %s2200_s11 = inlined_call_operand.vmem [shape: f32[2,32], index: 11, kind: input, shape index: {}]   ;;  %s2201_s12 = inlined_call_operand.vmem [shape: bf16[32,128], index: 12, kind: input, shape index: {}]   ;;  %s2202_s13 = inlined_call_operand.vmem [shape: f32[1,128], index: 13, kind: input, shape index: {}]   ;;  %s2203_s14 = inlined_call_operand.vmem [shape: f32[16,128], index: 14, kind: output, shape index: {0}]   ;;  %s2204_s15 = inlined_call_operand.hbm [shape: f32[2,32], index: 15, kind: output, shape index: {1}]   ;;  %s2205_s16 = inlined_call_operand.hbm [shape: f32[2,32], index: 16, kind: output, shape index: {2}]  }
   0x1   :  { %2207 = sst [smem:[#allocation9_spill]] %s2189_s0 }
   0x2   :  { %22 = vsyncpa [#allocation4], 0  ;;  %v1627_v0 = vld [vmem:[%s2190_s1 + $0x78] sm:$0xff]   ;;  %v1629_v2 = vld [vmem:[%s2190_s1 + $0x70] sm:$0xff]   ;;  %s2208_s17 = sld [smem:[#allocation9_spill]] }
   0x3   :  { %v1628_v1 = vld [vmem:[%s2190_s1 + $0x38] sm:$0xff]   ;;  %1469 = vmatprep.subr.bf16.mxu0 %v1627_v0  ;;  %v1630_v3 = vld [vmem:[%s2190_s1 + $0x30] sm:$0xff]   ;;  %v1631_v4 = vld [vmem:[%s2190_s1 + $0x68] sm:$0xff]  }
   0x4   :  { %1470 = vmatpush3.bf16.msra.mxu0 %v1628_v1  ;;  %v1632_v5 = vld [vmem:[%s2190_s1 + $0x28] sm:$0xff]   ;;  %v1633_v6 = vld [vmem:[%s2190_s1 + $0x60] sm:$0xff]   ;;  %v1635_v8 = vld [vmem:[%s2190_s1 + $0x58] sm:$0xff]  }
   0x5   :  { %1471 = vmatprep.subr.bf16.mxu0 %v1629_v2  ;;  %v1634_v7 = vld [vmem:[%s2190_s1 + $0x20] sm:$0xff]   ;;  %v1636_v9 = vld [vmem:[%s2190_s1 + $0x18] sm:$0xff]   ;;  %v1637_v10 = vld [vmem:[%s2190_s1 + $0x50] sm:$0xff]  }
   0x6   :  { %v1638_v11 = vld [vmem:[%s2190_s1 + $0x10] sm:$0xff]   ;;  %v1639_v13 = vld [vmem:[%s2190_s1 + $0x48] sm:$0xff]   ;;  %v1641_v15 = vld [vmem:[%s2190_s1 + $0x40] sm:$0xff]  }
   0x7   :  { %v1640_v14 = vld [vmem:[%s2190_s1 + $0x8] sm:$0xff]   ;;  %v1642_v16 = vld [vmem:[%s2190_s1] sm:$0xff]  }
   0x8   :  { %1472 = vmatpush3.bf16.msra.mxu0 %v1630_v3  ;;  %v1645_v12 = vld [vmem:[%s2208_s17 + $0x4] ss:$8 sps:$4 sm:$0xff]   ;;  %v1643_v17 = vld [vmem:[%s2208_s17] ss:$8 sps:$4 sm:$0xff]  }
   0x9   :  { %1473 = vmatprep.subr.bf16.mxu0 %v1631_v4  ;;  %232 = vmatprep.mubr.bf16.mxu0 %v1645_v12 }
   0xc   :  { %1474 = vmatpush3.bf16.msra.mxu0 %v1632_v5 }
   0xd   :  { %1475 = vmatprep.subr.bf16.mxu0 %v1633_v6 }
  0x10   :  { %1476 = vmatpush3.bf16.msra.mxu0 %v1634_v7 }
  0x11   :  { %1477 = vmatprep.subr.bf16.mxu0 %v1635_v8 }
  0x14   :  { %1478 = vmatpush3.bf16.msra.mxu0 %v1636_v9 }
  0x15   :  { %1479 = vmatprep.subr.bf16.mxu0 %v1637_v10 }
  0x18   :  { %1480 = vmatpush3.bf16.msra.mxu0 %v1638_v11 }
  0x19   :  { %1481 = vmatprep.subr.bf16.mxu0 %v1639_v13 }
  0x1c   :  { %1482 = vmatpush3.bf16.msra.mxu0 %v1640_v14 }
  0x1d   :  { %1483 = vmatprep.subr.bf16.mxu0 %v1641_v15 }
  0x20   :  { %1484 = vmatpush3.bf16.msra.mxu0 %v1642_v16 }
  0x21   :  { %23 = vsyncpa [#allocation6], 0  ;;  %v1646_v18 = vld [vmem:[%s2192_s3 + $0x8] sm:$0xff]   ;;  %v1784_v19 = vmov 0.0   ;;  %v1647_v20 = vld [vmem:[%s2192_s3] sm:$0xff]   ;;  %vm1785_vm0 = vmmov 0  }
  0x22   :  { %1527 = vmatprep.subr.bf16.mxu1 %v1784_v19  ;;  %1556 = vmatprep.subr.bf16.mxu0 %v1784_v19  ;;  %v321_v21 = vld [vmem:[%s2195_s6] sm:$0x7f]  ;;  %vm329_vm1 = vcmask 1046528   ;;  %vm267_vm2 = vcmask 261120   ;;  %vm322_vm3 = vcmask 56320   ;;  %v320_v35 = vld [vmem:[%s2198_s9 + $0x8] sm:$0xff] }
  0x23   :  { %233 = vmatmul.mubr.bf16.vlgmr.msra.gmra.mxu0 %v1643_v17  ;;  %1528 = vmatpush3.bf16.msra.mxu1 %v1646_v18  ;;  %v1403_v25 = vld [vmem:[%s2191_s2] ss:$0 sm:$0xff]  ;;  %v1648_v36 = vld [vmem:[%s2194_s5 + $0x8] sm:$0xff]   ;;  %s1787_s17 = smov 32   ;;  %vm568_vm4 = vcmask 254976   ;;  %vm769_vm5 = vcmask 259076  }
  0x24   :  { %1529 = vmatprep.subr.bf16.mxu1 %v1784_v19  ;;  %1531 = vmatprep.mubr.msk.bf16.mxu1 %vm1785_vm0, %v1784_v19  ;;  %v319_v34 = vld [vmem:[%s2198_s9] sm:$0xff]  ;;  %v1650_v47 = vld [vmem:[%s2196_s7 + $0x8] sm:$0xff]   ;;  %vm668_vm6 = vcmask 257026   ;;  %vm870_vm7 = vcmask 261126   ;;  %s1790_s23 = smov [#allocation5]  }
  0x25   :  { %1560 = vmatprep.mubr.msk.bf16.mxu0 %vm1785_vm0, %v1784_v19  ;;  %v1649_v37 = vld [vmem:[%s2194_s5] sm:$0xff]   ;;  %v1652_v16 = vld [vmem:[%s2196_s7 + $0x8] sm:$0xff]   ;;  %s1389_s24 = sshll.u32 %s1790_s23, 4  ;;  %s1390_s24 = int_to_ptr.vmem [resolvable:$true] %s1389_s24 }
  0x26   :  { %v1422_v38 = vld [vmem:[%s2193_s4] ss:$0 sm:$0xff]  ;;  %1557 = vmatpush3.bf16.msra.mxu0 %v1652_v16 }
  0x27   :  { %1530 = vmatpush3.bf16.msra.mxu1 %v1647_v20  ;;  %v1651_v49 = vld [vmem:[%s2196_s7] sm:$0xff]   ;;  %1558 = vmatprep.subr.bf16.mxu0 %v1784_v19 }
  0x28   :  { %1535 = vmatprep.subr.msk.mxu1 %vm329_vm1, %v321_v21  ;;  %v473_v50 = vld [vmem:[%s2199_s10] sm:$0x3]  ;;  %s1786_s10 = smov 64  }
  0x29   :  { %v475_v51 = vpack.c.bf16 %v473_v50, %v473_v50  ;;  %v1432_v57 = vld [vmem:[%s2197_s8] ss:$0 sm:$0xff] }
  0x2a   :  { %v474_v5 = vld [vmem:[%s2200_s11] sm:$0x3] }
  0x2b   :  { %v1653_v17 = vld [vmem:[%s2196_s7] sm:$0xff]  }
  0x2c   :  { %1559 = vmatpush3.bf16.msra.mxu0 %v1653_v17 }
  0x2d   :  { %1572 = vmatprep.subr.bf16.mxu0 %v1784_v19 }
  0xe3   :  { %v1485_v22 = vpop.f32.mrf.mxu0 }
  0xe5   :  { %v1486_v23 = vpop.f32.mrf.mxu0 }
  0xe6   :  { %v1487_v24 = vadd.f32 %v1486_v23, %v1485_v22 }
  0xe7   :  { %v1488_v26 = vpop.f32.mrf.mxu0 }
  0xe8   :  { %v235_v28 = vadd.f32 %v1487_v24, %v1403_v25 }
  0xe9   :  { %v1489_v27 = vpop.f32.mrf.mxu0 }
  0xea   :  { %v1490_v29 = vadd.f32 %v1489_v27, %v1488_v26  ;;  %v241_v31 = vmax.f32 %v235_v28, 0.0 }
  0xec   :  { %v238_v30 = vadd.f32 %v1490_v29, %v1403_v25 }
  0xee   :  { %v242_v32 = vmax.f32 %v238_v30, 0.0 }
  0xf0   :  { %v243_v33 = vpack.c.bf16 %v242_v32, %v241_v31 }
  0xf2   :  { %1532 = vmatmul.mubr.msk.bf16.vlgmr.msra.gmra.mxu1 %vm267_vm2, %v243_v33 }
  0xf3   :  { %1536 = vmatpush3.msk.msra.mxu1 %vm329_vm1, %v321_v21  ;;  %1537 = vmatprep.mubr.msk.f32.mxu1 %vm322_vm3, %v319_v34 }
  0xf4   :  { %1540 = vmatprep.subr.bf16.mxu1 %v1784_v19 }
  0xfa   :  { %1538 = vmatmul.mubr.msk.f32.vlgmr.msra.gmra.mxu1 %vm322_vm3, %v320_v35 }
  0xfb   :  { %1544 = vmatprep.mubr.msk.bf16.mxu1 %vm1785_vm0, %v1784_v19  ;;  %1541 = vmatpush3.bf16.msra.mxu1 %v1648_v36 }
  0xfc   :  { %1542 = vmatprep.subr.bf16.mxu1 %v1784_v19 }
  0xff   :  { %1543 = vmatpush3.bf16.msra.mxu1 %v1649_v37 }
 0x100   :  { %1548 = vmatprep.subr.bf16.mxu1 %v1784_v19 }
 0x1b2   :  { %v305_v39 = vpop.f32.mrf.mxu1 }
 0x1b3   :  { %v306_v41 = vadd.f32 %v1422_v38, %v305_v39 }
 0x1b4   :  { %v1533_v40 = vpop.f32.mrf.mxu1 }
 0x1b5   :  { %v312_v45 = vmax.f32 %v306_v41, 0.0  ;;  %v1654_v41 = vld [vmem:[%s2196_s7 + $0x8] sm:$0xff]  }
 0x1b6   :  { %v308_v42 = vpop.f32.mrf.mxu1 }
 0x1b7   :  { %v309_v43 = vadd.f32 %v1422_v38, %v308_v42  ;;  %v1655_v42 = vld [vmem:[%s2196_s7] sm:$0xff]  }
 0x1b8   :  { %v1534_v44 = vpop.f32.mrf.mxu1 }
 0x1b9   :  { %v313_v46 = vmax.f32 %v309_v43, 0.0 }
 0x1ba   :  { %v1539_v52 = vpop.f32.mrf.mxu1 }
 0x1bb   :  { %v314_v48 = vpack.c.bf16 %v313_v46, %v312_v45 }
 0x1bc   :  { %v399_v53 = vpop.f32.mrf.mxu1 }
 0x1bd   :  { %1545 = vmatmul.mubr.msk.bf16.vlgmr.msra.gmra.mxu1 %vm267_vm2, %v314_v48 }
 0x1be   :  { %1549 = vmatpush3.bf16.msra.mxu1 %v1650_v47  ;;  %1552 = vmatprep.mubr.msk.bf16.mxu1 %vm1785_vm0, %v1784_v19 }
 0x1bf   :  { %1550 = vmatprep.subr.bf16.mxu1 %v1784_v19 }
 0x1c2   :  { %1551 = vmatpush3.bf16.msra.mxu1 %v1651_v49 }
 0x1c3   :  { %1564 = vmatprep.subr.bf16.mxu1 %v1784_v19 }
 0x1c5   :  { %1553 = vmatmul.mubr.msk.bf16.vlgmr.msra.gmra.mxu1 %vm267_vm2, %v475_v51 }
 0x1c6   :  { %1568 = vmatprep.mubr.msk.bf16.mxu1 %vm1785_vm0, %v1784_v19  ;;  %1565 = vmatpush3.bf16.msra.mxu1 %v1654_v41 }
 0x1c7   :  { %1566 = vmatprep.subr.bf16.mxu1 %v1784_v19 }
 0x1ca   :  { %1567 = vmatpush3.bf16.msra.mxu1 %v1655_v42 }
 0x1cb   :  { %1580 = vmatprep.subr.bf16.mxu1 %v1784_v19 }
 0x27d   :  { %v457_v54 = vpop.f32.mrf.mxu1 }
 0x27e   :  { %v458_v56 = vadd.f32 %v457_v54, %v399_v53 }
 0x27f   :  { %v1546_v55 = vpop.f32.mrf.mxu1 }
 0x280   :  { %v1992_v61 = vadd.f32 %v1432_v57, %v458_v56 }
 0x281   :  { %v460_v58 = vpop.f32.mrf.mxu1 }
 0x282   :  { %v461_v59 = vadd.f32 %v1539_v52, %v460_v58 }
 0x283   :  { %v1547_v60 = vpop.f32.mrf.mxu1 }
 0x284   :  { %v1994_v62 = vadd.f32 %v1432_v57, %v461_v59 }
 0x285   :  { %v529_v63 = vpop.f32.mrf.mxu1 }
 0x286   :  { %v535_v0 = vadd.f32 %v529_v63, %v1992_v61 }
 0x287   :  { %v1554_v1 = vpop.f32.mrf.mxu1 }
 0x288   :  { %1668 = vtanh.f32 %v535_v0  ;;  %v1436_v6 = vmul.f32 -1.442695, %v535_v0 }
 0x289   :  { %v532_v2 = vpop.f32.mrf.mxu1 }
 0x28a   :  { %1670 = vpow2.f32 %v1436_v6 }
 0x28b   :  { %v1555_v3 = vpop.f32.mrf.mxu1 }
 0x295   :  { %v1669_v4 = vpop.eup %1668 }
 0x296   :  { %549 = vrot.lane.b32.xlu0 %v1669_v4, %s1786_s10  ;;  %v1656_v4 = vld [vmem:[%s2196_s7 + $0x8] sm:$0xff]  }
 0x297   :  { %v1671_v7 = vpop.eup %1670 }
 0x298   :  { %v539_v8 = vadd.f32 1.0, %v1671_v7 }
 0x29a   :  { %544 = vrot.lane.b32.xlu0 %v474_v5, %s1787_s17  ;;  %1672 = vrcp.f32 %v539_v8  ;;  %v1657_v5 = vld [vmem:[%s2196_s7] sm:$0xff]  }
 0x2a7   :  { %v1673_v9 = vpop.eup %1672 }
 0x308   :  { %v550_v10 = vpop.permute.xlu0 %549 }
 0x309   :  { %v552_v11 = vmul.f32 %v1673_v9, %v550_v10 }
 0x30b   :  { %554 = vrot.lane.b32.xlu1 %v552_v11, %s1787_s17 }
 0x30c   :  { %v545_v12 = vpop.permute.xlu0 %544 }
 0x30d   :  { %v547_v13 = vmul.f32 %v1673_v9, %v545_v12 }
 0x37d   :  { %v555_v14 = vpop.permute.xlu1 %554 }
 0x37e   :  { %v557_v15 = vadd.f32 %v555_v14, %v547_v13 }
 0x380   :  { %1674 = vtanh.f32 %v557_v15  ;;  %v645_v37 = vrot.slane %v557_v15, 6 }
 0x38d   :  { %v1675_v18 = vpop.eup %1674 }
 0x38e   :  { %560 = vrot.lane.b32.xlu1 %v1675_v18, %s1786_s10 }
 0x400   :  { %v561_v20 = vpop.permute.xlu1 %560 }
 0x401   :  { %v2012_v21 = vmul.f32 %v1673_v9, %v561_v20 }
 0x403   :  { %v570_v22 = vpack.c.bf16 %v2012_v21, %v2012_v21 }
 0x405   :  { %576 = vrot.lane.b32.xlu0 %v570_v22, %s1787_s17 }
 0x477   :  { %v577_v23 = vpop.permute.xlu0 %576 }
 0x478   :  { %1561 = vmatmul.mubr.msk.bf16.vlgmr.msra.gmra.mxu0 %vm267_vm2, %v577_v23 }
 0x479   :  { %1576 = vmatprep.mubr.msk.bf16.mxu0 %vm1785_vm0, %v1784_v19  ;;  %1573 = vmatpush3.bf16.msra.mxu0 %v1656_v4 }
 0x47a   :  { %1574 = vmatprep.subr.bf16.mxu0 %v1784_v19 }
 0x47d   :  { %1575 = vmatpush3.bf16.msra.mxu0 %v1657_v5 }
 0x47e   :  { %1588 = vmatprep.subr.bf16.mxu0 %v1784_v19 }
 0x538   :  { %v627_v24 = vpop.f32.mrf.mxu0 }
 0x539   :  { %v634_v25 = vrot.slane %v627_v24, 6 }
 0x53a   :  { %v1562_v26 = vpop.f32.mrf.mxu0 }
 0x53b   :  { %v636_v27 = vadd.f32 %v634_v25, %v1992_v61 }
 0x53c   :  { %v630_v28 = vpop.f32.mrf.mxu0 }
 0x53d   :  { %1676 = vtanh.f32 %v636_v27  ;;  %v1440_v31 = vmul.f32 -1.442695, %v636_v27 }
 0x53e   :  { %v1563_v29 = vpop.f32.mrf.mxu0 }
 0x53f   :  { %1678 = vpow2.f32 %v1440_v31  ;;  %v1659_v31 = vld [vmem:[%s2196_s7] sm:$0xff]  }
 0x54a   :  { %v1677_v30 = vpop.eup %1676 }
 0x54b   :  { %649 = vrot.lane.b32.xlu1 %v1677_v30, %s1786_s10  ;;  %v1658_v30 = vld [vmem:[%s2196_s7 + $0x8] sm:$0xff]  }
 0x54c   :  { %v1679_v32 = vpop.eup %1678 }
 0x54d   :  { %v640_v33 = vadd.f32 1.0, %v1679_v32 }
 0x54f   :  { %1680 = vrcp.f32 %v640_v33 }
 0x55c   :  { %v1681_v34 = vpop.eup %1680 }
 0x55d   :  { %v647_v38 = vmul.f32 %v1681_v34, %v645_v37 }
 0x5bd   :  { %v650_v35 = vpop.permute.xlu1 %649 }
 0x5be   :  { %v652_v36 = vmul.f32 %v1681_v34, %v650_v35 }
 0x5c0   :  { %654 = vrot.lane.b32.xlu0 %v652_v36, %s1787_s17 }
 0x632   :  { %v655_v39 = vpop.permute.xlu0 %654 }
 0x633   :  { %v657_v40 = vadd.f32 %v655_v39, %v647_v38 }
 0x635   :  { %1682 = vtanh.f32 %v657_v40  ;;  %v746_v0 = vrot.slane %v657_v40, 6 }
 0x642   :  { %v1683_v43 = vpop.eup %1682 }
 0x643   :  { %660 = vrot.lane.b32.xlu1 %v1683_v43, %s1786_s10 }
 0x6b5   :  { %v661_v44 = vpop.permute.xlu1 %660 }
 0x6b6   :  { %v2032_v45 = vmul.f32 %v1681_v34, %v661_v44 }
 0x6b8   :  { %v670_v46 = vpack.c.bf16 %v2032_v45, %v2032_v45 }
 0x6ba   :  { %v676_v47 = vrot.slane %v670_v46, 1 }
 0x6bc   :  { %677 = vrot.lane.b32.xlu0 %v676_v47, %s1787_s17 }
 0x72e   :  { %v678_v48 = vpop.permute.xlu0 %677 }
 0x72f   :  { %1569 = vmatmul.mubr.msk.bf16.vlgmr.msra.gmra.mxu1 %vm267_vm2, %v678_v48 }
 0x730   :  { %1584 = vmatprep.mubr.msk.bf16.mxu1 %vm1785_vm0, %v1784_v19  ;;  %1581 = vmatpush3.bf16.msra.mxu1 %v1658_v30 }
 0x731   :  { %1582 = vmatprep.subr.bf16.mxu1 %v1784_v19 }
 0x734   :  { %1583 = vmatpush3.bf16.msra.mxu1 %v1659_v31 }
 0x735   :  { %1596 = vmatprep.subr.bf16.mxu1 %v1784_v19 }
 0x7ef   :  { %v728_v49 = vpop.f32.mrf.mxu1 }
 0x7f0   :  { %v735_v50 = vrot.slane %v728_v49, 4 }
 0x7f1   :  { %v1570_v51 = vpop.f32.mrf.mxu1 }
 0x7f2   :  { %v737_v52 = vadd.f32 %v735_v50, %v1992_v61 }
 0x7f3   :  { %v731_v53 = vpop.f32.mrf.mxu1 }
 0x7f4   :  { %1684 = vtanh.f32 %v737_v52  ;;  %v1444_v56 = vmul.f32 -1.442695, %v737_v52 }
 0x7f5   :  { %v1571_v54 = vpop.f32.mrf.mxu1 }
 0x7f6   :  { %1686 = vpow2.f32 %v1444_v56  ;;  %v1661_v56 = vld [vmem:[%s2196_s7] sm:$0xff]  }
 0x801   :  { %v1685_v55 = vpop.eup %1684 }
 0x802   :  { %750 = vrot.lane.b32.xlu1 %v1685_v55, %s1786_s10  ;;  %v1660_v55 = vld [vmem:[%s2196_s7 + $0x8] sm:$0xff]  }
 0x803   :  { %v1687_v57 = vpop.eup %1686 }
 0x804   :  { %v741_v58 = vadd.f32 1.0, %v1687_v57 }
 0x806   :  { %1688 = vrcp.f32 %v741_v58 }
 0x813   :  { %v1689_v59 = vpop.eup %1688 }
 0x814   :  { %v748_v1 = vmul.f32 %v1689_v59, %v746_v0 }
 0x874   :  { %v751_v60 = vpop.permute.xlu1 %750 }
 0x875   :  { %v753_v63 = vmul.f32 %v1689_v59, %v751_v60 }
 0x877   :  { %755 = vrot.lane.b32.xlu0 %v753_v63, %s1787_s17 }
 0x8e9   :  { %v756_v2 = vpop.permute.xlu0 %755 }
 0x8ea   :  { %v758_v3 = vadd.f32 %v756_v2, %v748_v1 }
 0x8ec   :  { %1690 = vtanh.f32 %v758_v3  ;;  %v847_v27 = vrot.slane %v758_v3, 6 }
 0x8f9   :  { %v1691_v6 = vpop.eup %1690 }
 0x8fa   :  { %761 = vrot.lane.b32.xlu1 %v1691_v6, %s1786_s10 }
 0x96c   :  { %v762_v7 = vpop.permute.xlu1 %761 }
 0x96d   :  { %v2052_v8 = vmul.f32 %v1689_v59, %v762_v7 }
 0x96f   :  { %v771_v9 = vpack.c.bf16 %v2052_v8, %v2052_v8 }
 0x971   :  { %v777_v10 = vrot.slane %v771_v9, 2 }
 0x973   :  { %778 = vrot.lane.b32.xlu0 %v777_v10, %s1787_s17 }
 0x9e5   :  { %v779_v11 = vpop.permute.xlu0 %778 }
 0x9e6   :  { %1577 = vmatmul.mubr.msk.bf16.vlgmr.msra.gmra.mxu0 %vm267_vm2, %v779_v11 }
 0x9e7   :  { %1592 = vmatprep.mubr.msk.bf16.mxu0 %vm1785_vm0, %v1784_v19  ;;  %1589 = vmatpush3.bf16.msra.mxu0 %v1660_v55 }
 0x9e8   :  { %1590 = vmatprep.subr.bf16.mxu0 %v1784_v19 }
 0x9eb   :  { %1591 = vmatpush3.bf16.msra.mxu0 %v1661_v56 }
 0x9ec   :  { %1604 = vmatprep.subr.bf16.mxu0 %v1784_v19 }
 0xaa6   :  { %v829_v12 = vpop.f32.mrf.mxu0 }
 0xaa7   :  { %v836_v13 = vrot.slane %v829_v12, 2 }
 0xaa8   :  { %v1578_v14 = vpop.f32.mrf.mxu0 }
 0xaa9   :  { %v838_v15 = vadd.f32 %v836_v13, %v1992_v61 }
 0xaaa   :  { %v832_v16 = vpop.f32.mrf.mxu0 }
 0xaab   :  { %1692 = vtanh.f32 %v838_v15  ;;  %v1448_v20 = vmul.f32 -1.442695, %v838_v15 }
 0xaac   :  { %v1579_v17 = vpop.f32.mrf.mxu0 }
 0xaad   :  { %1694 = vpow2.f32 %v1448_v20  ;;  %v1663_v20 = vld [vmem:[%s2196_s7] sm:$0xff]  }
 0xab8   :  { %v1693_v18 = vpop.eup %1692 }
 0xab9   :  { %851 = vrot.lane.b32.xlu1 %v1693_v18, %s1786_s10  ;;  %v1662_v18 = vld [vmem:[%s2196_s7 + $0x8] sm:$0xff]  }
 0xaba   :  { %v1695_v22 = vpop.eup %1694 }
 0xabb   :  { %v842_v23 = vadd.f32 1.0, %v1695_v22 }
 0xabd   :  { %1696 = vrcp.f32 %v842_v23 }
 0xaca   :  { %v1697_v24 = vpop.eup %1696 }
 0xacb   :  { %v849_v28 = vmul.f32 %v1697_v24, %v847_v27 }
 0xb2b   :  { %v852_v25 = vpop.permute.xlu1 %851 }
 0xb2c   :  { %v854_v26 = vmul.f32 %v1697_v24, %v852_v25 }
 0xb2e   :  { %856 = vrot.lane.b32.xlu0 %v854_v26, %s1787_s17 }
 0xba0   :  { %v857_v29 = vpop.permute.xlu0 %856 }
 0xba1   :  { %v859_v61 = vadd.f32 %v857_v29, %v849_v28 }
 0xba3   :  { %1698 = vtanh.f32 %v859_v61  ;;  %v945_v51 = vrot.slane %v859_v61, 6 }
 0xbb0   :  { %v1699_v32 = vpop.eup %1698 }
 0xbb1   :  { %862 = vrot.lane.b32.xlu1 %v1699_v32, %s1786_s10 }
 0xc23   :  { %v863_v33 = vpop.permute.xlu1 %862 }
 0xc24   :  { %v2072_v34 = vmul.f32 %v1697_v24, %v863_v33 }
 0xc26   :  { %v872_v35 = vpack.c.bf16 %v2072_v34, %v2072_v34 }
 0xc28   :  { %v878_v36 = vrot.slane %v872_v35, 3 }
 0xc2a   :  { %879 = vrot.lane.b32.xlu0 %v878_v36, %s1787_s17 }
 0xc9c   :  { %v880_v37 = vpop.permute.xlu0 %879 }
 0xc9d   :  { %1585 = vmatmul.mubr.msk.bf16.vlgmr.msra.gmra.mxu1 %vm267_vm2, %v880_v37 }
 0xc9e   :  { %1600 = vmatprep.mubr.msk.bf16.mxu1 %vm1785_vm0, %v1784_v19  ;;  %1597 = vmatpush3.bf16.msra.mxu1 %v1662_v18 }
 0xc9f   :  { %1598 = vmatprep.subr.bf16.mxu1 %v1784_v19 }
 0xca2   :  { %1599 = vmatpush3.bf16.msra.mxu1 %v1663_v20 }
 0xca3   :  { %1612 = vmatprep.subr.bf16.mxu1 %v1784_v19 }
 0xd5d   :  { %v930_v38 = vpop.f32.mrf.mxu1 }
 0xd5e   :  { %v936_v39 = vadd.f32 %v930_v38, %v1994_v62 }
 0xd5f   :  { %v1586_v40 = vpop.f32.mrf.mxu1 }
 0xd60   :  { %1700 = vtanh.f32 %v936_v39  ;;  %v1452_v44 = vmul.f32 -1.442695, %v936_v39 }
 0xd61   :  { %v933_v41 = vpop.f32.mrf.mxu1 }
 0xd62   :  { %1702 = vpow2.f32 %v1452_v44 }
 0xd63   :  { %v1587_v42 = vpop.f32.mrf.mxu1 }
 0xd6d   :  { %v1701_v43 = vpop.eup %1700 }
 0xd6e   :  { %949 = vrot.lane.b32.xlu1 %v1701_v43, %s1786_s10 }
 0xd6f   :  { %v1703_v46 = vpop.eup %1702 }
 0xd70   :  { %v940_v47 = vadd.f32 1.0, %v1703_v46  ;;  %v1664_v46 = vld [vmem:[%s2196_s7 + $0x8] sm:$0xff]  }
 0xd72   :  { %1704 = vrcp.f32 %v940_v47  ;;  %v1665_v47 = vld [vmem:[%s2196_s7] sm:$0xff]  }
 0xd7f   :  { %v1705_v48 = vpop.eup %1704 }
 0xd80   :  { %v947_v52 = vmul.f32 %v1705_v48, %v945_v51 }
 0xde0   :  { %v950_v49 = vpop.permute.xlu1 %949 }
 0xde1   :  { %v952_v50 = vmul.f32 %v1705_v48, %v950_v49 }
 0xde3   :  { %954 = vrot.lane.b32.xlu0 %v952_v50, %s1787_s17 }
 0xe55   :  { %v955_v53 = vpop.permute.xlu0 %954 }
 0xe56   :  { %v957_v54 = vadd.f32 %v955_v53, %v947_v52 }
 0xe58   :  { %1706 = vtanh.f32 %v957_v54  ;;  %v1044_v14 = vrot.slane %v957_v54, 6 }
 0xe65   :  { %v1707_v57 = vpop.eup %1706 }
 0xe66   :  { %960 = vrot.lane.b32.xlu1 %v1707_v57, %s1786_s10 }
 0xed8   :  { %v961_v58 = vpop.permute.xlu1 %960 }
 0xed9   :  { %v2092_v59 = vmul.f32 %v1705_v48, %v961_v58 }
 0xedb   :  { %v969_v60 = vpack.c.bf16 %v2092_v59, %v2092_v59 }
 0xedd   :  { %975 = vrot.lane.b32.xlu0 %v969_v60, %s1787_s17 }
 0xf4f   :  { %v976_v63 = vpop.permute.xlu0 %975 }
 0xf50   :  { %1593 = vmatmul.mubr.msk.bf16.vlgmr.msra.gmra.mxu0 %vm267_vm2, %v976_v63 }
 0xf51   :  { %1608 = vmatprep.mubr.msk.bf16.mxu0 %vm1785_vm0, %v1784_v19  ;;  %1605 = vmatpush3.bf16.msra.mxu0 %v1664_v46 }
 0xf52   :  { %1606 = vmatprep.subr.bf16.mxu0 %v1784_v19 }
 0xf55   :  { %1607 = vmatpush3.bf16.msra.mxu0 %v1665_v47 }
0x1010   :  { %v1026_v0 = vpop.f32.mrf.mxu0 }
0x1011   :  { %v1033_v1 = vrot.slane %v1026_v0, 6 }
0x1012   :  { %v1594_v2 = vpop.f32.mrf.mxu0 }
0x1013   :  { %v1035_v3 = vadd.f32 %v1033_v1, %v1994_v62 }
0x1014   :  { %v1029_v4 = vpop.f32.mrf.mxu0 }
0x1015   :  { %1708 = vtanh.f32 %v1035_v3  ;;  %v1456_v7 = vmul.f32 -1.442695, %v1035_v3 }
0x1016   :  { %v1595_v5 = vpop.f32.mrf.mxu0 }
0x1017   :  { %1710 = vpow2.f32 %v1456_v7 }
0x1022   :  { %v1709_v6 = vpop.eup %1708 }
0x1023   :  { %1048 = vrot.lane.b32.xlu1 %v1709_v6, %s1786_s10 }
0x1024   :  { %v1711_v9 = vpop.eup %1710 }
0x1025   :  { %v1039_v10 = vadd.f32 1.0, %v1711_v9 }
0x1027   :  { %1712 = vrcp.f32 %v1039_v10 }
0x1034   :  { %v1713_v11 = vpop.eup %1712 }
0x1035   :  { %v1046_v15 = vmul.f32 %v1713_v11, %v1044_v14 }
0x1095   :  { %v1049_v12 = vpop.permute.xlu1 %1048 }
0x1096   :  { %v1051_v13 = vmul.f32 %v1713_v11, %v1049_v12 }
0x1098   :  { %1053 = vrot.lane.b32.xlu0 %v1051_v13, %s1787_s17  ;;  %v1667_v13 = vld [vmem:[%s2201_s12] sm:$0xff]  }
0x110a   :  { %v1054_v16 = vpop.permute.xlu0 %1053 }
0x110b   :  { %v1056_v17 = vadd.f32 %v1054_v16, %v1046_v15 }
0x110d   :  { %1714 = vtanh.f32 %v1056_v17  ;;  %v1144_v41 = vrot.slane %v1056_v17, 6 }
0x111a   :  { %v1715_v22 = vpop.eup %1714 }
0x111b   :  { %1059 = vrot.lane.b32.xlu1 %v1715_v22, %s1786_s10  ;;  %v1338_v22 = vlaneseq }
0x118d   :  { %v1060_v23 = vpop.permute.xlu1 %1059 }
0x118e   :  { %v2112_v24 = vmul.f32 %v1713_v11, %v1060_v23  ;;  %v2162_v23 = vand.u32 127, %v1338_v22 }
0x1190   :  { %v1068_v25 = vpack.c.bf16 %v2112_v24, %v2112_v24  ;;  %vm1340_vm8 = vcmp.lt.s32.totalorder %v2162_v23, 6 }
0x1192   :  { %v1074_v26 = vrot.slane %v1068_v25, 1 }
0x1194   :  { %1075 = vrot.lane.b32.xlu0 %v1074_v26, %s1787_s17 }
0x1206   :  { %v1076_v27 = vpop.permute.xlu0 %1075 }
0x1207   :  { %1601 = vmatmul.mubr.msk.bf16.vlgmr.msra.gmra.mxu1 %vm267_vm2, %v1076_v27 }
0x1208   :  { %1616 = vmatprep.mubr.msk.bf16.mxu1 %vm1785_vm0, %v1784_v19 }
0x12c7   :  { %v1126_v28 = vpop.f32.mrf.mxu1 }
0x12c8   :  { %v1133_v29 = vrot.slane %v1126_v28, 4 }
0x12c9   :  { %v1602_v61 = vpop.f32.mrf.mxu1 }
0x12ca   :  { %v1135_v30 = vadd.f32 %v1133_v29, %v1994_v62 }
0x12cb   :  { %v1129_v31 = vpop.f32.mrf.mxu1 }
0x12cc   :  { %1716 = vtanh.f32 %v1135_v30  ;;  %v1460_v35 = vmul.f32 -1.442695, %v1135_v30 }
0x12cd   :  { %v1603_v32 = vpop.f32.mrf.mxu1 }
0x12ce   :  { %1718 = vpow2.f32 %v1460_v35 }
0x12d9   :  { %v1717_v33 = vpop.eup %1716 }
0x12da   :  { %1148 = vrot.lane.b32.xlu1 %v1717_v33, %s1786_s10 }
0x12db   :  { %v1719_v36 = vpop.eup %1718 }
0x12dc   :  { %v1139_v37 = vadd.f32 1.0, %v1719_v36 }
0x12de   :  { %1720 = vrcp.f32 %v1139_v37 }
0x12eb   :  { %v1721_v38 = vpop.eup %1720 }
0x12ec   :  { %v1146_v42 = vmul.f32 %v1721_v38, %v1144_v41 }
0x134c   :  { %v1149_v39 = vpop.permute.xlu1 %1148 }
0x134d   :  { %v1151_v40 = vmul.f32 %v1721_v38, %v1149_v39 }
0x134f   :  { %1153 = vrot.lane.b32.xlu0 %v1151_v40, %s1787_s17 }
0x13c1   :  { %v1154_v43 = vpop.permute.xlu0 %1153 }
0x13c2   :  { %v1156_v44 = vadd.f32 %v1154_v43, %v1146_v42 }
0x13c4   :  { %1722 = vtanh.f32 %v1156_v44 }
0x13d1   :  { %v1723_v48 = vpop.eup %1722 }
0x13d2   :  { %1159 = vrot.lane.b32.xlu1 %v1723_v48, %s1786_s10 }
0x1444   :  { %v1160_v49 = vpop.permute.xlu1 %1159 }
0x1445   :  { %v1162_v50 = vmul.f32 %v1721_v38, %v1160_v49 }
0x1447   :  { %v1168_v51 = vpack.c.bf16 %v1162_v50, %v1162_v50 }
0x1449   :  { %v1174_v52 = vrot.slane %v1168_v51, 2 }
0x144b   :  { %1175 = vrot.lane.b32.xlu0 %v1174_v52, %s1787_s17 }
0x14bd   :  { %v1176_v53 = vpop.permute.xlu0 %1175 }
0x14be   :  { %1609 = vmatmul.mubr.msk.bf16.vlgmr.msra.gmra.mxu0 %vm267_vm2, %v1176_v53 }
0x157e   :  { %v1226_v54 = vpop.f32.mrf.mxu0 }
0x157f   :  { %v1233_v55 = vrot.slane %v1226_v54, 2 }
0x1580   :  { %v1610_v56 = vpop.f32.mrf.mxu0 }
0x1581   :  { %v1235_v57 = vadd.f32 %v1233_v55, %v1994_v62  ;;  %v1244_v62 = vrot.slane %v1156_v44, 6 }
0x1582   :  { %v1229_v58 = vpop.f32.mrf.mxu0 }
0x1583   :  { %1724 = vtanh.f32 %v1235_v57  ;;  %v1464_v0 = vmul.f32 -1.442695, %v1235_v57 }
0x1584   :  { %v1611_v60 = vpop.f32.mrf.mxu0 }
0x1585   :  { %1726 = vpow2.f32 %v1464_v0 }
0x1590   :  { %v1725_v63 = vpop.eup %1724 }
0x1591   :  { %1248 = vrot.lane.b32.xlu1 %v1725_v63, %s1786_s10 }
0x1592   :  { %v1727_v1 = vpop.eup %1726 }
0x1593   :  { %v1239_v2 = vadd.f32 1.0, %v1727_v1 }
0x1595   :  { %1728 = vrcp.f32 %v1239_v2 }
0x15a2   :  { %v1729_v3 = vpop.eup %1728 }
0x15a3   :  { %v1246_v6 = vmul.f32 %v1729_v3, %v1244_v62 }
0x1603   :  { %v1249_v4 = vpop.permute.xlu1 %1248 }
0x1604   :  { %v1251_v5 = vmul.f32 %v1729_v3, %v1249_v4 }
0x1606   :  { %1253 = vrot.lane.b32.xlu0 %v1251_v5, %s1787_s17 }
0x160a   :  { %565 = vrot.lane.b32.xlu0 %v2012_v21, %s1787_s17 }
0x160e   :  { %766 = vrot.lane.b32.xlu0 %v2052_v8, %s1787_s17 }
0x1612   :  { %965 = vrot.lane.b32.xlu0 %v2092_v59, %s1787_s17  ;;  %v1666_v59 = vld [vmem:[%s2201_s12 + $0x8] sm:$0xff]  }
0x1613   :  { %1613 = vmatpush3.bf16.msra.mxu1 %v1666_v59 }
0x1614   :  { %1614 = vmatprep.subr.bf16.mxu1 %v1784_v19 }
0x1616   :  { %1164 = vrot.lane.b32.xlu0 %v1162_v50, %s1787_s17 }
0x1617   :  { %1615 = vmatpush3.bf16.msra.mxu1 %v1667_v13 }
0x1678   :  { %v1254_v7 = vpop.permute.xlu0 %1253 }
0x1679   :  { %v1256_v9 = vadd.f32 %v1254_v7, %v1246_v6 }
0x167b   :  { %1730 = vtanh.f32 %v1256_v9 }
0x167c   :  { %v566_v10 = vpop.permute.xlu0 %565 }
0x167d   :  { %569 = vst.msk [vmem:[#allocation2] sm:$0x3] %vm568_vm4, %v566_v10 }
0x1680   :  { %v767_v11 = vpop.permute.xlu0 %766 }
0x1681   :  { %770 = vst.msk [vmem:[#allocation2] sm:$0x30] %vm769_vm5, %v767_v11 }
0x1684   :  { %v966_v21 = vpop.permute.xlu0 %965 }
0x1685   :  { %968 = vst.msk [vmem:[#allocation2 + $0x8] sm:$0x3] %vm568_vm4, %v966_v21 }
0x1688   :  { %v1731_v12 = vpop.eup %1730  ;;  %v1165_v8 = vpop.permute.xlu0 %1164 }
0x1689   :  { %1167 = vst.msk [vmem:[#allocation2 + $0x8] sm:$0x30] %vm769_vm5, %v1165_v8  ;;  %1259 = vrot.lane.b32.xlu1 %v1731_v12, %s1786_s10 }
0x168d   :  { %665 = vrot.lane.b32.xlu1 %v2032_v45, %s1787_s17 }
0x1691   :  { %867 = vrot.lane.b32.xlu1 %v2072_v34, %s1787_s17 }
0x1695   :  { %1064 = vrot.lane.b32.xlu1 %v2112_v24, %s1787_s17  ;;  %v1465_v24 = vld [vmem:[%s2202_s13] ss:$0 sm:$0xff]  ;;  %s1789_s13 = smov [#allocation3]  }
0x1696   :  { %s1379_s22 = sshll.u32 %s1789_s13, 4  ;;  %s1380_s22 = int_to_ptr.vmem [resolvable:$true] %s1379_s22 }
0x1697   :  { %s1740_s25 = scalar_lea.vmem %s1380_s22, 32  ;;  %p1745_p1 = scmp.lt.s32.totalorder %s1380_s22, %s1380_s22 }
0x1698   :  { %p1741_p0 = scmp.ne.s32.totalorder %s1380_s22, %s1740_s25  ;;  %p1746_p2 = scmp.lt.s32.totalorder %s1740_s25, %s1740_s25 }
0x169a   :  { %p1747_p3 = por %p1746_p2, %p1745_p1 }
0x169c   :  { %p1748_p4 = pnand %p1747_p3, %p1741_p0 }
0x16fb   :  { %v1260_v14 = vpop.permute.xlu1 %1259 }
0x16fc   :  { %v1262_v45 = vmul.f32 %v1729_v3, %v1260_v14 }
0x16fe   :  { %1264 = vrot.lane.b32.xlu1 %v1262_v45, %s1787_s17  ;;  %s1788_s17 = smov 96  }
0x16ff   :  { %v666_v34 = vpop.permute.xlu1 %665 }
0x1700   :  { %669 = vst.msk [vmem:[#allocation2] sm:$0xc] %vm668_vm6, %v666_v34 }
0x1703   :  { %v868_v15 = vpop.permute.xlu1 %867 }
0x1704   :  { %871 = vst.msk [vmem:[#allocation2] sm:$0xc0] %vm870_vm7, %v868_v15 }
0x1707   :  { %v1065_v16 = vpop.permute.xlu1 %1064 }
0x1708   :  { %1067 = vst.msk [vmem:[#allocation2 + $0x8] sm:$0xc] %vm668_vm6, %v1065_v16 }
0x170b   :  { %v1268_v19 = vld [vmem:[#allocation2] sm:$0xff] }
0x1770   :  { %v1265_v17 = vpop.permute.xlu1 %1264 }
0x1771   :  { %1267 = vst.msk [vmem:[#allocation2 + $0x8] sm:$0xc0] %vm870_vm7, %v1265_v17  ;;  %1365 = vst.msk [vmem:[#allocation3 - $0x6] sm:$0xc0] %vm870_vm7, %v1265_v17 }
0x1778   :  { %v1269_v18 = vld [vmem:[#allocation2 + $0x8] sm:$0xff] }
0x1779   :  { %v1270_v20 = vpack.c.bf16 %v1269_v18, %v1268_v19 }
0x177b   :  { %1617 = vmatmul.mubr.msk.bf16.vlgmr.msra.gmra.mxu1 %vm267_vm2, %v1270_v20 }
0x183b   :  { %v1331_v25 = vpop.f32.mrf.mxu1 }
0x183c   :  { %v1332_v26 = vadd.f32 %v1465_v24, %v1331_v25 }
0x183d   :  { %v1618_v27 = vpop.f32.mrf.mxu1 }
0x183e   :  { %v1341_v28 = vsel %vm1340_vm8, %v1332_v26, -inf }
0x183f   :  { %1343 = vmax.xlane.f32.xlu0 %v1341_v28  ;;  %v1334_v29 = vpop.f32.mrf.mxu1 }
0x1840   :  { %v1335_v61 = vadd.f32 %v1465_v24, %v1334_v29 }
0x1841   :  { %v1619_v30 = vpop.f32.mrf.mxu1 }
0x1842   :  { %v1342_v31 = vsel %vm1340_vm8, %v1335_v61, -inf }
0x1843   :  { %1345 = vmax.xlane.f32.xlu1 %v1342_v31 }
0x1854   :  { %1367 = vrot.lane.b32.xlu1 %v1256_v9, %s1788_s17 }
0x18c8   :  { %v1344_v32 = vpop.xlane.xlu0 %1343 }
0x18c9   :  { %v1347_v33 = vsub.f32 %v1341_v28, %v1344_v32 }
0x18cb   :  { %v1349_v35 = vmul.f32 1.442695, %v1347_v33 }
0x18cc   :  { %v1346_v36 = vpop.xlane.xlu1 %1345 }
0x18cd   :  { %1732 = vpow2.f32 %v1349_v35  ;;  %v1348_v37 = vsub.f32 %v1342_v31, %v1346_v36 }
0x18cf   :  { %v1351_v38 = vmul.f32 1.442695, %v1348_v37 }
0x18d0   :  { %v1368_v39 = vpop.permute.xlu1 %1367 }
0x18d1   :  { %1734 = vpow2.f32 %v1351_v38  ;;  %1370 = vst.msk [vmem:[#allocation5 - $0x6] sm:$0xc0] %vm870_vm7, %v1368_v39 }
0x18da   :  { %v1733_v40 = vpop.eup %1732 }
0x18db   :  { %1353 = vadd.xlane.f32.xlu0 %v1733_v40 }
0x18de   :  { %v1735_v41 = vpop.eup %1734 }
0x18df   :  { %1355 = vadd.xlane.f32.xlu0 %v1735_v41 }
0x18e0   :  { %1751 = shalt.err (!%p1748_p4)
}
0x18e1   :  { %1382 = dma.vmem_to_hbm [thread:$0]  %s1380_s22, 32, %s2204_s15, [#allocation4]  }
0x18e2   :  { %s1760_s27 = scalar_lea.vmem %s1390_s24, 32  ;;  %p1765_p6 = scmp.lt.s32.totalorder %s1390_s24, %s1390_s24 }
0x18e3   :  { %p1761_p5 = scmp.ne.s32.totalorder %s1390_s24, %s1760_s27  ;;  %p1766_p7 = scmp.lt.s32.totalorder %s1760_s27, %s1760_s27 }
0x18e5   :  { %p1767_p8 = por %p1766_p7, %p1765_p6 }
0x18e7   :  { %p1768_p9 = pnand %p1767_p8, %p1761_p5 }
0x18e9   :  { %1771 = shalt.err (!%p1768_p9)
}
0x18ea   :  { %1392 = dma.vmem_to_hbm [thread:$0]  %s1390_s24, 32, %s2205_s16, [#allocation6]  }
0x1964   :  { %v1354_v42 = vpop.xlane.xlu0 %1353 }
0x1965   :  { %1736 = vrcp.f32 %v1354_v42 }
0x1968   :  { %v1356_v43 = vpop.xlane.xlu0 %1355 }
0x1969   :  { %1738 = vrcp.f32 %v1356_v43 }
0x1972   :  { %v1737_v44 = vpop.eup %1736 }
0x1973   :  { %v1359_v46 = vmul.f32 %v1737_v44, %v1733_v40 }
0x1975   :  { %v1361_v47 = vsel %vm1340_vm8, %v1359_v46, %v1332_v26 }
0x1976   :  { %v1739_v48 = vpop.eup %1738  ;;  %1363 = vst [vmem:[%s2203_s14] sm:$0xff] %v1361_v47 }
0x1977   :  { %v1360_v49 = vmul.f32 %v1739_v48, %v1735_v41 }
0x1979   :  { %v1362_v50 = vsel %vm1340_vm8, %v1360_v49, %v1335_v61 }
0x197a   :  { %1364 = vst [vmem:[%s2203_s14 + $0x8] sm:$0xff] %v1362_v50 }
0x197b   :  { %1780 = dma.done.wait [#allocation4], 32  }
0x197c   :  { %1781 = vsyncadd [#allocation4], 4294967264 }
0x197d   :  { %1782 = dma.done.wait [#allocation6], 32  }
0x197e   :  { %1783 = vsyncadd [#allocation6], 4294967264 }
0x197f   :  { %1401 = vsyncpa [#allocation4], 1 }
0x1980   :  { %1402 = vsyncpa [#allocation6], 1 }

</bundles_post_ra>
